<compile_context>
chip_gen: v7x
topology: tpu7x:2x2x1
jax: 0.10.0
libtpu: 0.0.40
codegen_flags: <defaults>
</compile_context>

<pallas_src>
import functools
import math
import re

import jax
import jax.numpy as jnp
from jax import lax
from jax.experimental import pallas as pl
from jax.experimental.pallas import tpu as pltpu


# ---------------------------------------------------------------------------
# Kernel
# ---------------------------------------------------------------------------
def mha_kernel(x_ref, wqkv_ref, bqkv_ref, wo_ref, bo_ref, o_ref, *,
               num_head, head_dim, token_major_io, ew_dtype):
    """One token tile of the per-token multi-head attention.

    x_ref    : (H, TN) if channel-major I/O, (TN, H) if token-major I/O
    wqkv_ref : (3H, H) bf16, rows = [Wq ; Wk[perm] ; Wv]
    bqkv_ref : (3H, 1) f32
    wo_ref   : (H, H)  bf16
    bo_ref   : (H, 1)  f32 (channel-major) or (1, H) f32 (token-major)
    o_ref    : same layout as x_ref
    """
    f32 = jnp.float32
    H = num_head * head_dim

    # ---- fused Q/K/V projection: one MXU matmul, f32 accumulation ----------
    if token_major_io:
        # x tile is (TN, H); contracting both minor dims computes Wqkv @ x^T,
        # i.e. the (N,H)->(H,N) transpose is folded into the matmul instead of
        # being a separate XLA op with its own HBM round trip.
        x = x_ref[...].astype(wqkv_ref.dtype)                          # (TN, H)
        TN = x.shape[0]
        qkvT = lax.dot_general(wqkv_ref[...], x, (((1,), (1,)), ((), ())),
                               preferred_element_type=f32)             # (3H, TN)
    else:
        xT = x_ref[...].astype(wqkv_ref.dtype)                         # (H, TN)
        TN = xT.shape[1]
        qkvT = jnp.dot(wqkv_ref[...], xT, preferred_element_type=f32)  # (3H, TN)
    qkvT = qkvT + bqkv_ref[...]                       # lane-broadcast bias, f32

    scale = 1.0 / math.sqrt(head_dim)
    # ew_dtype: bf16 on v6e/v7x (bf16 VPU), f32 on v5e / unknown.
    qT = (qkvT[0:H, :] * scale).astype(ew_dtype)      # (H, TN)
    kT = qkvT[H:2 * H, :].astype(ew_dtype)            # rows pre-permuted in wrapper
    vT = qkvT[2 * H:3 * H, :].astype(ew_dtype)

    # Layout-free sublane splits (head_dim % 8 == 0 asserted in the wrapper).
    q3 = qT.reshape(num_head, head_dim, TN)   # q3[i,d,n] = scale * Q[n, i*hd+d]
    k3 = kT.reshape(num_head, head_dim, TN)   # k3[j,d,n] = K.view(-1,hd,nh)[n,d,j]
    v3 = vT.reshape(num_head, head_dim, TN)   # v3[j,d,n] = V[n, j*hd+d]

    # ---- scores, one query head at a time (keeps live vregs small) ---------
    # The nh*nh stabilized score rows are packed into one sublane-dense
    # (nh*nh, TN) slab so the single exp below runs at full vreg occupancy.
    z_rows = []
    for i in range(num_head):
        s_i = jnp.sum(q3[i] * k3, axis=1).astype(f32)   # (nh, TN): s[n,i,:]
        m_i = jnp.max(s_i, axis=0, keepdims=True)       # (1, TN)
        z_rows.append(s_i - m_i)
    z = jnp.concatenate(z_rows, axis=0)                 # (nh*nh, TN), dense
    e = jnp.exp(z)                                      # one dense EUP exp

    # ---- softmax normalization + context, one query head at a time ---------
    # TODO(synk): nn.Dropout(0.1) on the attention weights is identity in eval
    # mode; training-mode stochastic dropout is not implemented.
    ctx_rows = []
    for i in range(num_head):
        e_i = e[i * num_head:(i + 1) * num_head, :]            # (nh, TN)
        denom = jnp.sum(e_i, axis=0, keepdims=True)            # (1, TN)
        attn_i = (e_i * pl.reciprocal(denom, approx=True)).astype(ew_dtype)
        # ctx[i,d,n] = sum_j attn[i,j,n] * v3[j,d,n]
        ctx_rows.append(jnp.sum(attn_i[:, None, :] * v3, axis=0))   # (hd, TN)
    ctxT = jnp.concatenate(ctx_rows, axis=0).astype(wo_ref.dtype)   # (H, TN)

    # ---- output projection --------------------------------------------------
    if token_major_io:
        # out (TN, H) = ctx @ Wo^T + bo, with ctx held channel-major: contract
        # ctxT's major dim against Wo's minor dim (transpose folded into matmul).
        out = lax.dot_general(ctxT, wo_ref[...], (((0,), (1,)), ((), ())),
                              preferred_element_type=f32) + bo_ref[...]
        o_ref[...] = out.astype(o_ref.dtype)
    else:
        outT = (jnp.dot(wo_ref[...], ctxT, preferred_element_type=f32)
                + bo_ref[...])                                        # (H, TN)
        o_ref[...] = outT.astype(o_ref.dtype)


# ---------------------------------------------------------------------------
# Generation-dependent defaults and tiling
# ---------------------------------------------------------------------------
@functools.lru_cache(maxsize=1)
def _tpu_generation():
    try:
        kind = jax.devices()[0].device_kind
    except Exception:
        return 0
    m = re.search(r"(\d+)", kind)
    return int(m.group(1)) if m else 0


def _defaults():
    """(tile_n, min_steps, elementwise dtype) per TPU generation."""
    gen = _tpu_generation()
    if gen >= 7:
        # v7x: 2 TensorCores / 64 MiB VMEM -> smaller tiles, >=2 steps per core.
        return 256, 4, jnp.bfloat16
    if gen == 6:
        # v6e: 1 TC, bf16 VPU -> wide tiles, bf16 elementwise math.
        return 512, 2, jnp.bfloat16
    # v5e and older / unknown: 1 TC, no bf16 VALU -> wide tiles, f32 elementwise.
    return 512, 2, jnp.float32


def _pick_tile(n_tokens, tile_n, min_steps):
    """Minimal-padding lane tile: G = max(min_steps, cdiv(N, tile_n)) grid steps,
    TN = 128 * cdiv(cdiv(N, 128), G)."""
    nb = pl.cdiv(n_tokens, 128)
    g = max(min_steps, pl.cdiv(n_tokens, tile_n))
    tn = 128 * pl.cdiv(nb, g)
    n_pad = pl.cdiv(n_tokens, tn) * tn
    return tn, n_pad


def _prep_weights(params, num_head):
    """Fuse Wq/Wk/Wv -> (3H,H) stored bf16 (K's rows permuted so the kernel's
    8-aligned reshape reproduces PyTorch's K.view(-1, hd, nh)); biases stay f32."""
    H = params["wq"].shape[0]
    hd = H // num_head
    perm = jnp.arange(H).reshape(hd, num_head).T.reshape(-1)   # perm[j*hd+d]=d*nh+j
    wqkv = jnp.concatenate(
        [params["wq"], params["wk"][perm], params["wv"]], axis=0).astype(jnp.bfloat16)
    bqkv = jnp.concatenate(
        [params["bq"], params["bk"][perm], params["bv"]], axis=0).astype(jnp.float32)
    return (wqkv, bqkv,
            params["wo"].astype(jnp.bfloat16), params["bo"].astype(jnp.float32))


# ---------------------------------------------------------------------------
# Wrappers
# ---------------------------------------------------------------------------
def _mha(x2d, params, num_head, token_major_io, tile_n, min_steps):
    tn_default, ms_default, ew_dtype = _defaults()
    tile_n = tn_default if tile_n is None else tile_n
    min_steps = ms_default if min_steps is None else min_steps

    H = params["wq"].shape[0]
    assert H % num_head == 0
    head_dim = H // num_head
    assert head_dim % 8 == 0, (
        "this kernel requires head_dim % 8 == 0 (sublane granularity) so the "
        f"(num_head, head_dim) sublane splits are layout-free; got {head_dim}")
    assert tile_n % 128 == 0

    N = x2d.shape[0] if token_major_io else x2d.shape[1]
    TN, Np = _pick_tile(N, tile_n, min_steps)
    grid = Np // TN

    wqkv, bqkv, wo, bo = _prep_weights(params, num_head)

    const = lambda i: (0, 0)   # constant index_map -> weights stay VMEM-resident
    if token_major_io:
        if Np != N:
            # The attention never mixes tokens, so zero-padded rows are simply
            # sliced off again below (no masking needed).
            x2d = jnp.pad(x2d, ((0, Np - N), (0, 0)))
        x_spec = pl.BlockSpec((TN, H), lambda i: (i, 0))
        out_spec = pl.BlockSpec((TN, H), lambda i: (i, 0))
        out_shape = jax.ShapeDtypeStruct((Np, H), x2d.dtype)
        bo = bo.reshape(1, H)
    else:
        if Np != N:
            x2d = jnp.pad(x2d, ((0, 0), (0, Np - N)))
        x_spec = pl.BlockSpec((H, TN), lambda i: (0, i))
        out_spec = pl.BlockSpec((H, TN), lambda i: (0, i))
        out_shape = jax.ShapeDtypeStruct((H, Np), x2d.dtype)

    kernel = functools.partial(mha_kernel, num_head=num_head, head_dim=head_dim,
                               token_major_io=token_major_io, ew_dtype=ew_dtype)
    out = pl.pallas_call(
        kernel,
        out_shape=out_shape,
        grid=(grid,),
        in_specs=[
            x_spec,                             # activation tile
            pl.BlockSpec((3 * H, H), const),    # fused Wqkv (bf16)
            pl.BlockSpec((3 * H, 1), const),    # fused bqkv (f32)
            pl.BlockSpec((H, H), const),        # Wo (bf16)
            pl.BlockSpec(bo.shape, const),      # bo (f32)
        ],
        out_specs=out_spec,
        compiler_params=pltpu.CompilerParams(dimension_semantics=("parallel",)),
    )(x2d, wqkv, bqkv, wo, bo)

    if Np == N:
        return out
    return out[:N] if token_major_io else out[:, :N]


@functools.partial(jax.jit, static_argnames=("num_head", "tile_n", "min_steps"))
def multihead_attention(x, params, num_head, *, tile_n=None, min_steps=None):
    """PyTorch-convention forward: x (N, H) -> (N, H), eval mode.

    The (N,H)<->(H,N) layout swap is folded into the kernel's matmuls via
    dot_general dimension numbers -- no separate XLA transposes."""
    return _mha(x, params, num_head, True, tile_n, min_steps)


@functools.partial(jax.jit, static_argnames=("num_head", "tile_n", "min_steps"))
def multihead_attention_hn(xT, params, num_head, *, tile_n=None, min_steps=None):
    """Channel-major fast path: xT (H, N) -> (H, N), zero layout changes."""
    return _mha(xT, params, num_head, False, tile_n, min_steps)


# ---------------------------------------------------------------------------
# Reference + test
# ---------------------------------------------------------------------------
def init_params(key, hidden_dim):
    """Deterministic init mimicking nn.Linear's U(-1/sqrt(in), 1/sqrt(in))."""
    bound = 1.0 / math.sqrt(hidden_dim)
    ks = jax.random.split(key, 8)
    u = lambda k, shape: jax.random.uniform(k, shape, jnp.float32, -bound, bound)
    return {
        "wq": u(ks[0], (hidden_dim, hidden_dim)), "bq": u(ks[1], (hidden_dim, 1)),
        "wk": u(ks[2], (hidden_dim, hidden_dim)), "bk": u(ks[3], (hidden_dim, 1)),
        "wv": u(ks[4], (hidden_dim, hidden_dim)), "bv": u(ks[5], (hidden_dim, 1)),
        "wo": u(ks[6], (hidden_dim, hidden_dim)), "bo": u(ks[7], (hidden_dim, 1)),
    }


def ref_forward(x, params, num_head):
    """Pure-JAX f32 reference matching the PyTorch forward exactly (eval mode)."""
    H = x.shape[-1]
    hd = H // num_head
    Q = x @ params["wq"].T + params["bq"][:, 0]
    K = x @ params["wk"].T + params["bk"][:, 0]
    V = x @ params["wv"].T + params["bv"][:, 0]
    Q = Q.reshape(-1, num_head, hd)
    K = K.reshape(-1, hd, num_head)            # view, not transpose (as in PyTorch)
    V = V.reshape(-1, num_head, hd)
    s = jnp.einsum("nij,njk->nik", Q, K) / jnp.sqrt(jnp.float32(hd))
    a = jax.nn.softmax(s, axis=-1)
    c = jnp.einsum("nij,njk->nik", a, V).reshape(-1, H)
    return c @ params["wo"].T + params["bo"][:, 0]


if __name__ == "__main__":
    hidden_dim, num_head = 32, 4

    key = jax.random.PRNGKey(0)
    kx1, kx2, kp = jax.random.split(key, 3)
    params = init_params(kp, hidden_dim)

    # Tolerance accounts for bf16 MXU operands, gen-gated bf16 elementwise math
    # (v6e/v7x) and the approximate EUP reciprocal in the softmax, all compared
    # against a pure-f32 reference.
    tol = dict(atol=2e-2, rtol=2e-2)

    # N=1024 exercises the multi-step tile path; N=200 exercises the
    # pad-to-multiple-of-128 + tail-slice path.
    for kx, N in ((kx1, 1024), (kx2, 200)):
        x = jax.random.normal(kx, (N, hidden_dim), dtype=jnp.float32)
        ref = ref_forward(x, params, num_head)

        out = jax.block_until_ready(multihead_attention(x, params, num_head=num_head))
        assert out.shape == ref.shape == (N, hidden_dim)
        assert jnp.allclose(out, ref, **tol), (
            f"token-major N={N}: max abs diff "
            f"{float(jnp.max(jnp.abs(out - ref)))}")

        # Channel-major fast path (the transposes here are test-harness only).
        out_hn = jax.block_until_ready(
            multihead_attention_hn(x.T, params, num_head=num_head))
        assert out_hn.shape == (hidden_dim, N)
        assert jnp.allclose(out_hn.T, ref, **tol), (
            f"channel-major N={N}: max abs diff "
            f"{float(jnp.max(jnp.abs(out_hn.T - ref)))}")

    print("KERNEL_OK")
</pallas_src>

<mosaic_0001>
module attributes {stable_mosaic.version = 11 : i64} {
  func.func @mha_kernel(%arg0: i32, %arg1: memref<512x32xf32, #tpu.memory_space<vmem>>, %arg2: memref<96x32xbf16, #tpu.memory_space<vmem>>, %arg3: memref<96x1xf32, #tpu.memory_space<vmem>>, %arg4: memref<32x32xbf16, #tpu.memory_space<vmem>>, %arg5: memref<1x32xf32, #tpu.memory_space<vmem>>, %arg6: memref<512x32xf32, #tpu.memory_space<vmem>>) attributes {dimension_semantics = [#tpu.dimension_semantics<parallel>], iteration_bounds = array<i64: 2>, scalar_prefetch = 0 : i64, scratch_operands = 0 : i64, tpu.core_type = #tpu.core_type<tc>, window_params = [{transform_indices = @transform_0, window_bounds = array<i64: 512, 32>}, {pipeline_mode = #tpu.pipeline_mode<synchronous>, transform_indices = @transform_1, window_bounds = array<i64: 96, 32>}, {pipeline_mode = #tpu.pipeline_mode<synchronous>, transform_indices = @transform_2, window_bounds = array<i64: 96, 1>}, {pipeline_mode = #tpu.pipeline_mode<synchronous>, transform_indices = @transform_3, window_bounds = array<i64: 32, 32>}, {pipeline_mode = #tpu.pipeline_mode<synchronous>, transform_indices = @transform_4, window_bounds = array<i64: 1, 32>}, {transform_indices = @transform_5, window_bounds = array<i64: 512, 32>}]} {
    %c0 = arith.constant 0 : index
    %c0_0 = arith.constant 0 : index
    %0 = vector.load %arg1[%c0, %c0_0] : memref<512x32xf32, #tpu.memory_space<vmem>>, vector<512x32xf32>
    %1 = arith.truncf %0 : vector<512x32xf32> to vector<512x32xbf16>
    %c0_1 = arith.constant 0 : index
    %c0_2 = arith.constant 0 : index
    %2 = vector.load %arg2[%c0_1, %c0_2] : memref<96x32xbf16, #tpu.memory_space<vmem>>, vector<96x32xbf16>
    %cst = arith.constant dense<0.000000e+00> : vector<96x512xf32>
    %3 = tpu.matmul %2, %1, %cst {dimension_numbers = #tpu.dot_dimension_numbers<[1], [1], [0], [0], [0, 0, 1, 0], [], []>} : vector<96x32xbf16>, vector<512x32xbf16>, vector<96x512xf32> -> vector<96x512xf32>
    %c0_3 = arith.constant 0 : index
    %c0_4 = arith.constant 0 : index
    %4 = vector.load %arg3[%c0_3, %c0_4] : memref<96x1xf32, #tpu.memory_space<vmem>>, vector<96x1xf32>
    %5 = vector.broadcast %4 : vector<96x1xf32> to vector<96x512xf32>
    %6 = arith.addf %3, %5 : vector<96x512xf32>
    %7 = vector.extract_strided_slice %6 {offsets = [0, 0], sizes = [32, 512], strides = [1, 1]} : vector<96x512xf32> to vector<32x512xf32>
    %cst_5 = arith.constant 0.353553385 : f32
    %8 = vector.broadcast %cst_5 : f32 to vector<32x512xf32>
    %9 = arith.mulf %7, %8 : vector<32x512xf32>
    %10 = vector.extract_strided_slice %6 {offsets = [32, 0], sizes = [32, 512], strides = [1, 1]} : vector<96x512xf32> to vector<32x512xf32>
    %11 = vector.extract_strided_slice %6 {offsets = [64, 0], sizes = [32, 512], strides = [1, 1]} : vector<96x512xf32> to vector<32x512xf32>
    %12 = vector.shape_cast %9 : vector<32x512xf32> to vector<4x8x512xf32>
    %13 = vector.shape_cast %10 : vector<32x512xf32> to vector<4x8x512xf32>
    %14 = vector.shape_cast %11 : vector<32x512xf32> to vector<4x8x512xf32>
    %15 = vector.extract_strided_slice %12 {offsets = [0, 0, 0], sizes = [1, 8, 512], strides = [1, 1, 1]} : vector<4x8x512xf32> to vector<1x8x512xf32>
    %16 = vector.shape_cast %15 : vector<1x8x512xf32> to vector<8x512xf32>
    %17 = vector.shape_cast %16 : vector<8x512xf32> to vector<1x8x512xf32>
    %18 = vector.broadcast %17 : vector<1x8x512xf32> to vector<4x8x512xf32>
    %19 = arith.mulf %18, %13 : vector<4x8x512xf32>
    %cst_6 = arith.constant dense<0.000000e+00> : vector<4x512xf32>
    %20 = vector.multi_reduction <add>, %19, %cst_6 [1] : vector<4x8x512xf32> to vector<4x512xf32>
    %cst_7 = arith.constant dense<0xFF800000> : vector<512xf32>
    %21 = vector.multi_reduction <maximumf>, %20, %cst_7 [0] : vector<4x512xf32> to vector<512xf32>
    %22 = vector.shape_cast %21 : vector<512xf32> to vector<1x512xf32>
    %23 = vector.broadcast %22 : vector<1x512xf32> to vector<4x512xf32>
    %24 = arith.subf %20, %23 : vector<4x512xf32>
    %25 = vector.extract_strided_slice %12 {offsets = [1, 0, 0], sizes = [1, 8, 512], strides = [1, 1, 1]} : vector<4x8x512xf32> to vector<1x8x512xf32>
    %26 = vector.shape_cast %25 : vector<1x8x512xf32> to vector<8x512xf32>
    %27 = vector.shape_cast %26 : vector<8x512xf32> to vector<1x8x512xf32>
    %28 = vector.broadcast %27 : vector<1x8x512xf32> to vector<4x8x512xf32>
    %29 = arith.mulf %28, %13 : vector<4x8x512xf32>
    %cst_8 = arith.constant dense<0.000000e+00> : vector<4x512xf32>
    %30 = vector.multi_reduction <add>, %29, %cst_8 [1] : vector<4x8x512xf32> to vector<4x512xf32>
    %cst_9 = arith.constant dense<0xFF800000> : vector<512xf32>
    %31 = vector.multi_reduction <maximumf>, %30, %cst_9 [0] : vector<4x512xf32> to vector<512xf32>
    %32 = vector.shape_cast %31 : vector<512xf32> to vector<1x512xf32>
    %33 = vector.broadcast %32 : vector<1x512xf32> to vector<4x512xf32>
    %34 = arith.subf %30, %33 : vector<4x512xf32>
    %35 = vector.extract_strided_slice %12 {offsets = [2, 0, 0], sizes = [1, 8, 512], strides = [1, 1, 1]} : vector<4x8x512xf32> to vector<1x8x512xf32>
    %36 = vector.shape_cast %35 : vector<1x8x512xf32> to vector<8x512xf32>
    %37 = vector.shape_cast %36 : vector<8x512xf32> to vector<1x8x512xf32>
    %38 = vector.broadcast %37 : vector<1x8x512xf32> to vector<4x8x512xf32>
    %39 = arith.mulf %38, %13 : vector<4x8x512xf32>
    %cst_10 = arith.constant dense<0.000000e+00> : vector<4x512xf32>
    %40 = vector.multi_reduction <add>, %39, %cst_10 [1] : vector<4x8x512xf32> to vector<4x512xf32>
    %cst_11 = arith.constant dense<0xFF800000> : vector<512xf32>
    %41 = vector.multi_reduction <maximumf>, %40, %cst_11 [0] : vector<4x512xf32> to vector<512xf32>
    %42 = vector.shape_cast %41 : vector<512xf32> to vector<1x512xf32>
    %43 = vector.broadcast %42 : vector<1x512xf32> to vector<4x512xf32>
    %44 = arith.subf %40, %43 : vector<4x512xf32>
    %45 = vector.extract_strided_slice %12 {offsets = [3, 0, 0], sizes = [1, 8, 512], strides = [1, 1, 1]} : vector<4x8x512xf32> to vector<1x8x512xf32>
    %46 = vector.shape_cast %45 : vector<1x8x512xf32> to vector<8x512xf32>
    %47 = vector.shape_cast %46 : vector<8x512xf32> to vector<1x8x512xf32>
    %48 = vector.broadcast %47 : vector<1x8x512xf32> to vector<4x8x512xf32>
    %49 = arith.mulf %48, %13 : vector<4x8x512xf32>
    %cst_12 = arith.constant dense<0.000000e+00> : vector<4x512xf32>
    %50 = vector.multi_reduction <add>, %49, %cst_12 [1] : vector<4x8x512xf32> to vector<4x512xf32>
    %cst_13 = arith.constant dense<0xFF800000> : vector<512xf32>
    %51 = vector.multi_reduction <maximumf>, %50, %cst_13 [0] : vector<4x512xf32> to vector<512xf32>
    %52 = vector.shape_cast %51 : vector<512xf32> to vector<1x512xf32>
    %53 = vector.broadcast %52 : vector<1x512xf32> to vector<4x512xf32>
    %54 = arith.subf %50, %53 : vector<4x512xf32>
    %55 = tpu.concatenate %24, %34, %44, %54 in 0 : vector<4x512xf32>, vector<4x512xf32>, vector<4x512xf32>, vector<4x512xf32> -> vector<16x512xf32>
    %56 = math.exp %55 : vector<16x512xf32>
    %57 = vector.extract_strided_slice %56 {offsets = [0, 0], sizes = [4, 512], strides = [1, 1]} : vector<16x512xf32> to vector<4x512xf32>
    %cst_14 = arith.constant dense<0.000000e+00> : vector<512xf32>
    %58 = vector.multi_reduction <add>, %57, %cst_14 [0] : vector<4x512xf32> to vector<512xf32>
    %59 = vector.shape_cast %58 : vector<512xf32> to vector<1x512xf32>
    %60 = tpu.reciprocal %59 {approx = true} : vector<1x512xf32> -> vector<1x512xf32>
    %61 = vector.broadcast %60 : vector<1x512xf32> to vector<4x512xf32>
    %62 = arith.mulf %57, %61 : vector<4x512xf32>
    %63 = vector.shape_cast %62 : vector<4x512xf32> to vector<4x1x512xf32>
    %64 = vector.broadcast %63 : vector<4x1x512xf32> to vector<4x8x512xf32>
    %65 = arith.mulf %64, %14 : vector<4x8x512xf32>
    %cst_15 = arith.constant dense<0.000000e+00> : vector<8x512xf32>
    %66 = vector.multi_reduction <add>, %65, %cst_15 [0] : vector<4x8x512xf32> to vector<8x512xf32>
    %67 = vector.extract_strided_slice %56 {offsets = [4, 0], sizes = [4, 512], strides = [1, 1]} : vector<16x512xf32> to vector<4x512xf32>
    %cst_16 = arith.constant dense<0.000000e+00> : vector<512xf32>
    %68 = vector.multi_reduction <add>, %67, %cst_16 [0] : vector<4x512xf32> to vector<512xf32>
    %69 = vector.shape_cast %68 : vector<512xf32> to vector<1x512xf32>
    %70 = tpu.reciprocal %69 {approx = true} : vector<1x512xf32> -> vector<1x512xf32>
    %71 = vector.broadcast %70 : vector<1x512xf32> to vector<4x512xf32>
    %72 = arith.mulf %67, %71 : vector<4x512xf32>
    %73 = vector.shape_cast %72 : vector<4x512xf32> to vector<4x1x512xf32>
    %74 = vector.broadcast %73 : vector<4x1x512xf32> to vector<4x8x512xf32>
    %75 = arith.mulf %74, %14 : vector<4x8x512xf32>
    %cst_17 = arith.constant dense<0.000000e+00> : vector<8x512xf32>
    %76 = vector.multi_reduction <add>, %75, %cst_17 [0] : vector<4x8x512xf32> to vector<8x512xf32>
    %77 = vector.extract_strided_slice %56 {offsets = [8, 0], sizes = [4, 512], strides = [1, 1]} : vector<16x512xf32> to vector<4x512xf32>
    %cst_18 = arith.constant dense<0.000000e+00> : vector<512xf32>
    %78 = vector.multi_reduction <add>, %77, %cst_18 [0] : vector<4x512xf32> to vector<512xf32>
    %79 = vector.shape_cast %78 : vector<512xf32> to vector<1x512xf32>
    %80 = tpu.reciprocal %79 {approx = true} : vector<1x512xf32> -> vector<1x512xf32>
    %81 = vector.broadcast %80 : vector<1x512xf32> to vector<4x512xf32>
    %82 = arith.mulf %77, %81 : vector<4x512xf32>
    %83 = vector.shape_cast %82 : vector<4x512xf32> to vector<4x1x512xf32>
    %84 = vector.broadcast %83 : vector<4x1x512xf32> to vector<4x8x512xf32>
    %85 = arith.mulf %84, %14 : vector<4x8x512xf32>
    %cst_19 = arith.constant dense<0.000000e+00> : vector<8x512xf32>
    %86 = vector.multi_reduction <add>, %85, %cst_19 [0] : vector<4x8x512xf32> to vector<8x512xf32>
    %87 = vector.extract_strided_slice %56 {offsets = [12, 0], sizes = [4, 512], strides = [1, 1]} : vector<16x512xf32> to vector<4x512xf32>
    %cst_20 = arith.constant dense<0.000000e+00> : vector<512xf32>
    %88 = vector.multi_reduction <add>, %87, %cst_20 [0] : vector<4x512xf32> to vector<512xf32>
    %89 = vector.shape_cast %88 : vector<512xf32> to vector<1x512xf32>
    %90 = tpu.reciprocal %89 {approx = true} : vector<1x512xf32> -> vector<1x512xf32>
    %91 = vector.broadcast %90 : vector<1x512xf32> to vector<4x512xf32>
    %92 = arith.mulf %87, %91 : vector<4x512xf32>
    %93 = vector.shape_cast %92 : vector<4x512xf32> to vector<4x1x512xf32>
    %94 = vector.broadcast %93 : vector<4x1x512xf32> to vector<4x8x512xf32>
    %95 = arith.mulf %94, %14 : vector<4x8x512xf32>
    %cst_21 = arith.constant dense<0.000000e+00> : vector<8x512xf32>
    %96 = vector.multi_reduction <add>, %95, %cst_21 [0] : vector<4x8x512xf32> to vector<8x512xf32>
    %97 = tpu.concatenate %66, %76, %86, %96 in 0 : vector<8x512xf32>, vector<8x512xf32>, vector<8x512xf32>, vector<8x512xf32> -> vector<32x512xf32>
    %98 = arith.truncf %97 : vector<32x512xf32> to vector<32x512xbf16>
    %c0_22 = arith.constant 0 : index
    %c0_23 = arith.constant 0 : index
    %99 = vector.load %arg4[%c0_22, %c0_23] : memref<32x32xbf16, #tpu.memory_space<vmem>>, vector<32x32xbf16>
    %cst_24 = arith.constant dense<0.000000e+00> : vector<512x32xf32>
    %100 = tpu.matmul %98, %99, %cst_24 {dimension_numbers = #tpu.dot_dimension_numbers<[0], [1], [1], [0], [0, 1, 1, 0], [], []>} : vector<32x512xbf16>, vector<32x32xbf16>, vector<512x32xf32> -> vector<512x32xf32>
    %c0_25 = arith.constant 0 : index
    %c0_26 = arith.constant 0 : index
    %101 = vector.load %arg5[%c0_25, %c0_26] : memref<1x32xf32, #tpu.memory_space<vmem>>, vector<1x32xf32>
    %102 = vector.broadcast %101 : vector<1x32xf32> to vector<512x32xf32>
    %103 = arith.addf %100, %102 : vector<512x32xf32>
    %c0_27 = arith.constant 0 : index
    %c0_28 = arith.constant 0 : index
    %104 = vector.load %arg6[%c0_27, %c0_28] : memref<512x32xf32, #tpu.memory_space<vmem>>, vector<512x32xf32>
    tpu.vector_store %arg6[%c0_27, %c0_28], %103 {strides = array<i32>} : memref<512x32xf32, #tpu.memory_space<vmem>>, vector<512x32xf32>,
    return
  }
  func.func @transform_0(%arg0: i32) -> (i32, i32) {
    %c0_i32 = arith.constant 0 : i32
    %c0_i32_0 = arith.constant 0 : i32
    return %arg0, %c0_i32 : i32, i32
  }
  func.func @transform_1(%arg0: i32) -> (i32, i32) {
    %c0_i32 = arith.constant 0 : i32
    %c0_i32_0 = arith.constant 0 : i32
    %c0_i32_1 = arith.constant 0 : i32
    return %c0_i32, %c0_i32_0 : i32, i32
  }
  func.func @transform_2(%arg0: i32) -> (i32, i32) {
    %c0_i32 = arith.constant 0 : i32
    %c0_i32_0 = arith.constant 0 : i32
    %c0_i32_1 = arith.constant 0 : i32
    return %c0_i32, %c0_i32_0 : i32, i32
  }
  func.func @transform_3(%arg0: i32) -> (i32, i32) {
    %c0_i32 = arith.constant 0 : i32
    %c0_i32_0 = arith.constant 0 : i32
    %c0_i32_1 = arith.constant 0 : i32
    return %c0_i32, %c0_i32_0 : i32, i32
  }
  func.func @transform_4(%arg0: i32) -> (i32, i32) {
    %c0_i32 = arith.constant 0 : i32
    %c0_i32_0 = arith.constant 0 : i32
    %c0_i32_1 = arith.constant 0 : i32
    return %c0_i32, %c0_i32_0 : i32, i32
  }
  func.func @transform_5(%arg0: i32) -> (i32, i32) {
    %c0_i32 = arith.constant 0 : i32
    %c0_i32_0 = arith.constant 0 : i32
    return %arg0, %c0_i32 : i32, i32
  }
}

</mosaic_0001>

<bundles_post_ra>
// kernel: multihead_attention.1
= control target key start
LH: loop header
LB: loop body
LE: loop exit
PB: predicated region body
PF: predicated region fallthrough
CT: control target
= control target key end

     0   :  { %s3235_s18 = smov 0   ;;  %s4893_s0 = inlined_call_operand.vmem [shape: f32[1024,32], index: 0, kind: input, shape index: {}]   ;;  %s4894_s1 = inlined_call_operand.vmem [shape: bf16[96,32], index: 1, kind: input, shape index: {}]   ;;  %s4895_s2 = inlined_call_operand.vmem [shape: f32[96,1], index: 2, kind: input, shape index: {}]   ;;  %s4896_s3 = inlined_call_operand.vmem [shape: bf16[32,32], index: 3, kind: input, shape index: {}]   ;;  %s4897_s4 = inlined_call_operand.vmem [shape: f32[1,32], index: 4, kind: input, shape index: {}]   ;;  %s4898_s5 = inlined_call_operand.vmem [shape: f32[1024,32], index: 5, kind: output, shape index: {}]  }
   0x1 LB: > { %s2887_s19 = sadd.s32 4294967295, %s3201_s18   ;;  %p2891_p0 = scmp.ge.s32.totalorder %s3201_s18, 1  ;;  %s3201_s18 = sphi %s3235_s18, %s15_s18  }
   0x2   : > { %p188_p1 = scmp.lt.s32.totalorder %s3201_s18, 3 }
   0x4   : > { %p189_p2 = pnand %p2891_p0, %p188_p1 }
   0x6   : > { %192 = sbr.rel (%p189_p2) target bundleno = 1040 (0x410), region = 40 }
   0xd   : > { %s2892_s20 = sshll.u32 %s2887_s19, 6  ;;  %v3246_v0 = vld [vmem:[%s4894_s1] sm:$0xff]   ;;  %vm439_vm0 = vcmask 261120   ;;  %v3203_v27 = vmov 0   ;;  %v338_v32 = vld [vmem:[%s4895_s2 + $0x8] sm:$0xff]  ;;  %v339_v37 = vld [vmem:[%s4895_s2 + $0x10] sm:$0xff] }
   0xe   : > { %p217_p3 = scmp.lt.s32.totalorder %s2892_s20, 127  ;;  %2967 = vmatprep.mubr.msk.bf16.mxu1 %vm439_vm0, %v3246_v0  ;;  %3137 = vset.pattern.permute.xlu0 %v3203_v27  ;;  %v337_v28 = vld [vmem:[%s4895_s2] sm:$0xff]  ;;  %v340_v45 = vld [vmem:[%s4895_s2 + $0x18] sm:$0xff]  ;;  %v342_v48 = vld [vmem:[%s4895_s2 + $0x28] sm:$0xff]  ;;  %vm1333_vm1 = vcmask 1041409   ;;  %vm1336_vm2 = vcmask 1042434  }
   0xf   : > { %351 = vperm.xlu0 %3137, %v337_v28   ;;  %3138 = vset.pattern.permute.xlu1 %v3203_v27  ;;  %v341_v46 = vld [vmem:[%s4895_s2 + $0x20] sm:$0xff]  ;;  %v343_v55 = vld [vmem:[%s4895_s2 + $0x30] sm:$0xff]  ;;  %v344_v56 = vld [vmem:[%s4895_s2 + $0x38] sm:$0xff]  ;;  %vm1381_vm3 = vcmask 1045509   ;;  %vm1339_vm4 = vcmask 1043459   ;;  %vm1384_vm5 = vcmask 1046534  }
  0x10   : > { %s5070_s20 = smov (!%p217_p3, %s2892_s20), 127  ;;  %361 = vperm.xlu1 %3138, %v339_v37   ;;  %v345_v58 = vld [vmem:[%s4895_s2 + $0x40] sm:$0xff]  ;;  %v346_v61 = vld [vmem:[%s4895_s2 + $0x48] sm:$0xff]  ;;  %vm1387_vm6 = vcmask 1047559   ;;  %vm1506_vm7 = vcmask 1043456  }
  0x11   : > { %s2893_s23 = sshll.u32 %s5070_s20, 3 }
  0x12   : > { %s3258_s26 = scalar_lea.vmem %s4893_s0, %s2893_s23  ;;  %s4696_s25 = scalar_lea.vmem %s4898_s5, %s2893_s23 }
  0x13   : > { %v245_v1 = vld [vmem:[%s3258_s26 + $0x80] sm:$0xff]  ;;  %v246_v2 = vld [vmem:[%s3258_s26 + $0x88] sm:$0xff]  ;;  %v247_v6 = vld [vmem:[%s3258_s26 + $0x90] sm:$0xff]  ;;  %356 = vperm.xlu0 %3137, %v338_v32  }
  0x14   : > { %v229_v3 = vld [vmem:[%s3258_s26] sm:$0xff]  ;;  %v301_v4 = vpack.c.bf16 %v246_v2, %v245_v1  ;;  %v230_v5 = vld [vmem:[%s3258_s26 + $0x8] sm:$0xff]  ;;  %v248_v7 = vld [vmem:[%s3258_s26 + $0x98] sm:$0xff]  ;;  %366 = vperm.xlu1 %3138, %v340_v45  }
  0x15   : > { %v293_v8 = vpack.c.bf16 %v230_v5, %v229_v3  ;;  %v302_v9 = vpack.c.bf16 %v248_v7, %v247_v6  ;;  %v231_v10 = vld [vmem:[%s3258_s26 + $0x10] sm:$0xff]  ;;  %v232_v11 = vld [vmem:[%s3258_s26 + $0x18] sm:$0xff]  ;;  %v249_v14 = vld [vmem:[%s3258_s26 + $0xa0] sm:$0xff] }
  0x16   : > { %3109 = vmatprep.subr.msk.bf16.mxu1 %vm439_vm0, %v301_v4  ;;  %v294_v13 = vpack.c.bf16 %v232_v11, %v231_v10  ;;  %v250_v15 = vld [vmem:[%s3258_s26 + $0xa8] sm:$0xff]  ;;  %v233_v18 = vld [vmem:[%s3258_s26 + $0x20] sm:$0xff]  ;;  %v251_v21 = vld [vmem:[%s3258_s26 + $0xb0] sm:$0xff] }
  0x17   : > { %v459_v12 = vsel %vm439_vm0, %v293_v8, 0  ;;  %v303_v17 = vpack.c.bf16 %v250_v15, %v249_v14  ;;  %v234_v19 = vld [vmem:[%s3258_s26 + $0x28] sm:$0xff]  ;;  %v252_v22 = vld [vmem:[%s3258_s26 + $0xb8] sm:$0xff]  ;;  %v235_v25 = vld [vmem:[%s3258_s26 + $0x30] sm:$0xff]  ;;  %371 = vperm.xlu0 %3137, %v341_v46  }
  0x18   : > { %2952 = vmatpush3.bf16.xpose.msra.mxu1 %v459_v12  ;;  %v462_v16 = vsel %vm439_vm0, %v294_v13, 0  ;;  %v295_v20 = vpack.c.bf16 %v234_v19, %v233_v18  ;;  %v304_v24 = vpack.c.bf16 %v252_v22, %v251_v21  ;;  %v236_v26 = vld [vmem:[%s3258_s26 + $0x38] sm:$0xff]  ;;  %v253_v30 = vld [vmem:[%s3258_s26 + $0xc0] sm:$0xff]  ;;  %v254_v31 = vld [vmem:[%s3258_s26 + $0xc8] sm:$0xff]  ;;  %376 = vperm.xlu1 %3138, %v342_v48  }
  0x19   : > { %3110 = vmatprep.subr.msk.bf16.mxu1 %vm439_vm0, %v302_v9  ;;  %v296_v29 = vpack.c.bf16 %v236_v26, %v235_v25  ;;  %v305_v34 = vpack.c.bf16 %v254_v31, %v253_v30  ;;  %v237_v35 = vld [vmem:[%s3258_s26 + $0x40] sm:$0xff]  ;;  %v238_v36 = vld [vmem:[%s3258_s26 + $0x48] sm:$0xff]  ;;  %v255_v39 = vld [vmem:[%s3258_s26 + $0xd0] sm:$0xff] }
  0x1a   : > { %v465_v23 = vsel %vm439_vm0, %v295_v20, 0  ;;  %v297_v38 = vpack.c.bf16 %v238_v36, %v237_v35  ;;  %v256_v40 = vld [vmem:[%s3258_s26 + $0xd8] sm:$0xff]  ;;  %v239_v43 = vld [vmem:[%s3258_s26 + $0x50] sm:$0xff]  ;;  %v257_v49 = vld [vmem:[%s3258_s26 + $0xe0] sm:$0xff] }
  0x1b   : > { %v468_v33 = vsel %vm439_vm0, %v296_v29, 0  ;;  %v306_v42 = vpack.c.bf16 %v256_v40, %v255_v39  ;;  %v240_v44 = vld [vmem:[%s3258_s26 + $0x58] sm:$0xff]  ;;  %v258_v50 = vld [vmem:[%s3258_s26 + $0xe8] sm:$0xff]  ;;  %v241_v53 = vld [vmem:[%s3258_s26 + $0x60] sm:$0xff]  ;;  %381 = vperm.xlu0 %3137, %v343_v55  }
  0x1c   : > { %v471_v41 = vsel %vm439_vm0, %v297_v38, 0  ;;  %v298_v47 = vpack.c.bf16 %v240_v44, %v239_v43  ;;  %v307_v52 = vpack.c.bf16 %v258_v50, %v257_v49  ;;  %v242_v54 = vld [vmem:[%s3258_s26 + $0x68] sm:$0xff]  ;;  %386 = vperm.xlu1 %3138, %v344_v56   ;;  %v259_v59 = vld [vmem:[%s3258_s26 + $0xf0] sm:$0xff]  ;;  %v260_v60 = vld [vmem:[%s3258_s26 + $0xf8] sm:$0xff] }
  0x1d   : > { %v299_v57 = vpack.c.bf16 %v242_v54, %v241_v53  ;;  %v308_v63 = vpack.c.bf16 %v260_v60, %v259_v59  ;;  %v347_v1 = vld [vmem:[%s4895_s2 + $0x50] sm:$0xff]  ;;  %v244_v3 = vld [vmem:[%s3258_s26 + $0x78] sm:$0xff]  ;;  %v277_v6 = vld [vmem:[%s3258_s26 + $0x180] sm:$0xff] }
  0x1e   : > { %v474_v51 = vsel %vm439_vm0, %v298_v47, 0  ;;  %v243_v2 = vld [vmem:[%s3258_s26 + $0x70] sm:$0xff]  ;;  %v348_v4 = vld [vmem:[%s4895_s2 + $0x58] sm:$0xff]  ;;  %v278_v7 = vld [vmem:[%s3258_s26 + $0x188] sm:$0xff] }
  0x1f   : > { %391 = vperm.xlu0 %3137, %v345_v58   ;;  %v477_v62 = vsel %vm439_vm0, %v299_v57, 0  ;;  %v300_v5 = vpack.c.bf16 %v244_v3, %v243_v2  ;;  %v317_v9 = vpack.c.bf16 %v278_v7, %v277_v6  ;;  %v261_v10 = vld [vmem:[%s3258_s26 + $0x100] sm:$0xff]  ;;  %v262_v11 = vld [vmem:[%s3258_s26 + $0x108] sm:$0xff]  ;;  %v279_v13 = vld [vmem:[%s3258_s26 + $0x190] sm:$0xff] }
  0x20   : > { %2954 = vmatpush3.bf16.xpose.msra.mxu1 %v462_v16  ;;  %396 = vperm.xlu1 %3138, %v346_v61   ;;  %v309_v12 = vpack.c.bf16 %v262_v11, %v261_v10  ;;  %v280_v14 = vld [vmem:[%s3258_s26 + $0x198] sm:$0xff]  ;;  %v3354_v15 = vld [vmem:[%s4894_s1 + $0x8] sm:$0xff]   ;;  %v263_v18 = vld [vmem:[%s3258_s26 + $0x110] sm:$0xff] }
  0x21   : > { %3111 = vmatprep.subr.msk.bf16.mxu1 %vm439_vm0, %v303_v17  ;;  %v480_v8 = vsel %vm439_vm0, %v300_v5, 0  ;;  %v318_v17 = vpack.c.bf16 %v280_v14, %v279_v13  ;;  %v264_v19 = vld [vmem:[%s3258_s26 + $0x118] sm:$0xff]  ;;  %v281_v21 = vld [vmem:[%s3258_s26 + $0x1a0] sm:$0xff]  ;;  %v282_v22 = vld [vmem:[%s3258_s26 + $0x1a8] sm:$0xff] }
  0x22   : > { %v507_v16 = vsel %vm439_vm0, %v309_v12, 0  ;;  %v310_v20 = vpack.c.bf16 %v264_v19, %v263_v18  ;;  %v319_v25 = vpack.c.bf16 %v282_v22, %v281_v21  ;;  %v265_v26 = vld [vmem:[%s3258_s26 + $0x120] sm:$0xff]  ;;  %v266_v27 = vld [vmem:[%s3258_s26 + $0x128] sm:$0xff]  ;;  %v283_v29 = vld [vmem:[%s3258_s26 + $0x1b0] sm:$0xff] }
  0x23   : > { %401 = vperm.xlu0 %3137, %v347_v1   ;;  %v311_v28 = vpack.c.bf16 %v266_v27, %v265_v26  ;;  %v284_v30 = vld [vmem:[%s3258_s26 + $0x1b8] sm:$0xff]  ;;  %v285_v37 = vld [vmem:[%s3258_s26 + $0x1c0] sm:$0xff]  ;;  %v286_v38 = vld [vmem:[%s3258_s26 + $0x1c8] sm:$0xff] }
  0x24   : > { %406 = vperm.xlu1 %3138, %v348_v4   ;;  %v3142_v31 = vld [vmem:[%s4894_s1 + $0x18] sm:$0xff]   ;;  %v3143_v39 = vld [vmem:[%s4894_s1 + $0x20] sm:$0xff]   ;;  %v270_v43 = vld [vmem:[%s3258_s26 + $0x148] sm:$0xff] }
  0x25   : > { %v513_v32 = vsel %vm439_vm0, %v311_v28, 0  ;;  %v268_v35 = vld [vmem:[%s3258_s26 + $0x138] sm:$0xff]  ;;  %v287_v45 = vld [vmem:[%s3258_s26 + $0x1d0] sm:$0xff]  ;;  %v3144_v47 = vld [vmem:[%s4894_s1 + $0x28] sm:$0xff]  }
  0x26   : > { %v288_v46 = vld [vmem:[%s3258_s26 + $0x1d8] sm:$0xff]  ;;  %v271_v50 = vld [vmem:[%s3258_s26 + $0x150] sm:$0xff]  ;;  %v289_v53 = vld [vmem:[%s3258_s26 + $0x1e0] sm:$0xff] }
  0x27   : > { %v322_v49 = vpack.c.bf16 %v288_v46, %v287_v45  ;;  %v290_v54 = vld [vmem:[%s3258_s26 + $0x1e8] sm:$0xff]  ;;  %v273_v57 = vld [vmem:[%s3258_s26 + $0x160] sm:$0xff]  ;;  %v291_v60 = vld [vmem:[%s3258_s26 + $0x1f0] sm:$0xff] }
  0x28   : > { %2956 = vmatpush3.bf16.xpose.msra.mxu1 %v465_v23  ;;  %v3369_v23 = vld [vmem:[%s4894_s1 + $0x10] sm:$0xff]   ;;  %v323_v56 = vpack.c.bf16 %v290_v54, %v289_v53  ;;  %v274_v58 = vld [vmem:[%s3258_s26 + $0x168] sm:$0xff]  ;;  %v292_v61 = vld [vmem:[%s3258_s26 + $0x1f8] sm:$0xff] }
  0x29   : > { %3112 = vmatprep.subr.msk.bf16.mxu1 %vm439_vm0, %v304_v24  ;;  %v510_v24 = vsel %vm439_vm0, %v310_v20, 0  ;;  %v315_v59 = vpack.c.bf16 %v274_v58, %v273_v57  ;;  %v275_v1 = vld [vmem:[%s3258_s26 + $0x170] sm:$0xff]  ;;  %v276_v2 = vld [vmem:[%s3258_s26 + $0x178] sm:$0xff] }
  0x2a   : > { %v316_v3 = vpack.c.bf16 %v276_v2, %v275_v1 }
  0x2c   : > { %v528_v4 = vsel %vm439_vm0, %v316_v3, 0 }
  0x30   : > { %2958 = vmatpush3.bf16.xpose.msra.mxu1 %v468_v33  ;;  %v320_v33 = vpack.c.bf16 %v284_v30, %v283_v29 }
  0x31   : > { %3113 = vmatprep.subr.msk.bf16.mxu1 %vm439_vm0, %v305_v34  ;;  %v267_v34 = vld [vmem:[%s3258_s26 + $0x130] sm:$0xff] }
  0x32   : > { %v312_v36 = vpack.c.bf16 %v268_v35, %v267_v34 }
  0x34   : > { %v516_v40 = vsel %vm439_vm0, %v312_v36, 0 }
  0x38   : > { %2960 = vmatpush3.bf16.xpose.msra.mxu1 %v471_v41  ;;  %v321_v41 = vpack.c.bf16 %v286_v38, %v285_v37 }
  0x39   : > { %3114 = vmatprep.subr.msk.bf16.mxu1 %vm439_vm0, %v306_v42  ;;  %v269_v42 = vld [vmem:[%s3258_s26 + $0x140] sm:$0xff] }
  0x3a   : > { %v313_v44 = vpack.c.bf16 %v270_v43, %v269_v42 }
  0x3c   : > { %v519_v48 = vsel %vm439_vm0, %v313_v44, 0 }
  0x40   : > { %2962 = vmatpush3.bf16.xpose.msra.mxu1 %v474_v51  ;;  %v272_v51 = vld [vmem:[%s3258_s26 + $0x158] sm:$0xff] }
  0x41   : > { %3115 = vmatprep.subr.msk.bf16.mxu1 %vm439_vm0, %v307_v52  ;;  %v314_v52 = vpack.c.bf16 %v272_v51, %v271_v50 }
  0x43   : > { %v522_v55 = vsel %vm439_vm0, %v314_v52, 0 }
  0x48   : > { %2964 = vmatpush3.bf16.xpose.msra.mxu1 %v477_v62  ;;  %v525_v62 = vsel %vm439_vm0, %v315_v59, 0 }
  0x49   : > { %3116 = vmatprep.subr.msk.bf16.mxu1 %vm439_vm0, %v308_v63  ;;  %v324_v63 = vpack.c.bf16 %v292_v61, %v291_v60 }
  0x50   : > { %2966 = vmatpush3.bf16.xpose.msra.mxu1 %v480_v8 }
  0x51   : > { %3117 = vmatprep.subr.msk.bf16.mxu1 %vm439_vm0, %v317_v9 }
  0x57   : > { %2968 = vmatmul.mubr.msk.bf16.vlgmr.msra.gmra.mrb[0].mxu1 %vm439_vm0, %v3246_v0 }
  0x58   : > { %2980 = vmatpush3.bf16.xpose.msra.mxu1 %v507_v16  ;;  %2969 = vmatprep.mubr.msk.bf16.mxu1 %vm439_vm0, %v3354_v15 }
  0x59   : > { %3118 = vmatprep.subr.msk.bf16.mxu1 %vm439_vm0, %v318_v17 }
  0x5f   : > { %2970 = vmatmul.mubr.msk.bf16.gmra.mrb[4].mxu1 %vm439_vm0, %v3354_v15 }
  0x60   : > { %2982 = vmatpush3.bf16.xpose.msra.mxu1 %v510_v24  ;;  %2971 = vmatprep.mubr.msk.bf16.mxu1 %vm439_vm0, %v3369_v23 }
  0x61   : > { %3119 = vmatprep.subr.msk.bf16.mxu1 %vm439_vm0, %v319_v25 }
  0x67   : > { %2972 = vmatmul.mubr.msk.bf16.gmra.mrb[8].mxu1 %vm439_vm0, %v3369_v23 }
  0x68   : > { %2984 = vmatpush3.bf16.xpose.msra.mxu1 %v513_v32  ;;  %2973 = vmatprep.mubr.msk.bf16.mxu1 %vm439_vm0, %v3142_v31 }
  0x69   : > { %3120 = vmatprep.subr.msk.bf16.mxu1 %vm439_vm0, %v320_v33 }
  0x6f   : > { %2974 = vmatmul.mubr.msk.bf16.gmra.mrb[12].mxu1 %vm439_vm0, %v3142_v31 }
  0x70   : > { %2986 = vmatpush3.bf16.xpose.msra.mxu1 %v516_v40  ;;  %2975 = vmatprep.mubr.msk.bf16.mxu1 %vm439_vm0, %v3143_v39 }
  0x71   : > { %3121 = vmatprep.subr.msk.bf16.mxu1 %vm439_vm0, %v321_v41 }
  0x77   : > { %2976 = vmatmul.mubr.msk.bf16.gmra.mrb[16].mxu1 %vm439_vm0, %v3143_v39 }
  0x78   : > { %2988 = vmatpush3.bf16.xpose.msra.mxu1 %v519_v48  ;;  %2977 = vmatprep.mubr.msk.bf16.mxu1 %vm439_vm0, %v3144_v47 }
  0x79   : > { %3122 = vmatprep.subr.msk.bf16.mxu1 %vm439_vm0, %v322_v49 }
  0x7f   : > { %2978 = vmatmul.mubr.msk.bf16.gmra.mrb[20].mxu1 %vm439_vm0, %v3144_v47 }
  0x80   : > { %2990 = vmatpush3.bf16.xpose.msra.mxu1 %v522_v55  ;;  %2995 = vmatprep.mubr.msk.bf16.mxu1 %vm439_vm0, %v3246_v0 }
  0x81   : > { %3123 = vmatprep.subr.msk.bf16.mxu1 %vm439_vm0, %v323_v56 }
  0x88   : > { %2992 = vmatpush3.bf16.xpose.msra.mxu1 %v525_v62 }
  0x89   : > { %3124 = vmatprep.subr.msk.bf16.mxu1 %vm439_vm0, %v324_v63 }
  0x8e   : > { %v3445_v7 = vpop.permute.xlu0 %351 }
  0x8f   : > { %4942 = vst [vmem:[#allocation2_spill] sm:$0xff] %v3445_v7  ;;  %v3447_v9 = vpop.permute.xlu1 %361 }
  0x90   : > { %2994 = vmatpush3.bf16.xpose.msra.mxu1 %v528_v4  ;;  %4943 = vst [vmem:[#allocation3_spill] sm:$0xff] %v3447_v9 }
  0x92   : > { %v3449_v11 = vpop.permute.xlu0 %356 }
  0x93   : > { %4944 = vst [vmem:[#allocation4_spill] sm:$0xff] %v3449_v11  ;;  %v3451_v13 = vpop.permute.xlu1 %366 }
  0x94   : > { %4945 = vst [vmem:[#allocation5_spill] sm:$0xff] %v3451_v13 }
  0x96   : > { %v3461_v24 = vpop.permute.xlu0 %371 }
  0x97   : > { %2996 = vmatmul.mubr.msk.bf16.vlgmr.msra.gmra.mrb[24].mxu1 %vm439_vm0, %v3246_v0  ;;  %4946 = vst [vmem:[#allocation6_spill] sm:$0xff] %v3461_v24 }
  0x98   : > { %2997 = vmatprep.mubr.msk.bf16.mxu1 %vm439_vm0, %v3354_v15 }
  0x9f   : > { %2998 = vmatmul.mubr.msk.bf16.gmra.mrb[28].mxu1 %vm439_vm0, %v3354_v15 }
  0xa0   : > { %2999 = vmatprep.mubr.msk.bf16.mxu1 %vm439_vm0, %v3369_v23 }
  0xa7   : > { %3000 = vmatmul.mubr.msk.bf16.gmra.mrb[32].mxu1 %vm439_vm0, %v3369_v23 }
  0xa8   : > { %3001 = vmatprep.mubr.msk.bf16.mxu1 %vm439_vm0, %v3142_v31 }
  0xaf   : > { %3002 = vmatmul.mubr.msk.bf16.gmra.mrb[36].mxu1 %vm439_vm0, %v3142_v31 }
  0xb0   : > { %3003 = vmatprep.mubr.msk.bf16.mxu1 %vm439_vm0, %v3143_v39 }
  0xb7   : > { %3004 = vmatmul.mubr.msk.bf16.gmra.mrb[40].mxu1 %vm439_vm0, %v3143_v39 }
  0xb8   : > { %3005 = vmatprep.mubr.msk.bf16.mxu1 %vm439_vm0, %v3144_v47 }
  0xbf   : > { %3006 = vmatmul.mubr.msk.bf16.gmra.mrb[44].mxu1 %vm439_vm0, %v3144_v47 }
 0x12a   : > { %v588_v0 = vpop.f32.mrb[0].mxu1 }
 0x12b   : > { %v590_v5 = vpop.f32.mrb[1].mxu1  ;;  %v589_v20 = vadd.f32 %v588_v0, %v3445_v7 }
 0x12c   : > { %v592_v6 = vpop.f32.mrb[2].mxu1  ;;  %v591_v22 = vadd.f32 %v590_v5, %v3445_v7 }
 0x12d   : > { %v594_v8 = vpop.f32.mrb[3].mxu1  ;;  %v593_v21 = vadd.f32 %v592_v6, %v3449_v11  ;;  %v3471_v30 = vmul.f32 0.35355338, %v589_v20 }
 0x12e   : > { %v595_v23 = vadd.f32 %v594_v8, %v3449_v11  ;;  %v3476_v34 = vmul.f32 0.35355338, %v591_v22 }
 0x12f   : > { %v3473_v31 = vmul.f32 0.35355338, %v593_v21 }
 0x130   : > { %v3478_v35 = vmul.f32 0.35355338, %v595_v23 }
 0x132   : > { %v598_v10 = vpop.f32.mrb[4].mxu1 }
 0x133   : > { %v600_v12 = vpop.f32.mrb[5].mxu1  ;;  %v599_v15 = vadd.f32 %v598_v10, %v3447_v9 }
 0x134   : > { %v602_v14 = vpop.f32.mrb[6].mxu1  ;;  %v601_v18 = vadd.f32 %v600_v12, %v3447_v9 }
 0x135   : > { %v603_v16 = vadd.f32 %v602_v14, %v3451_v13  ;;  %v604_v17 = vpop.f32.mrb[7].mxu1  ;;  %v3463_v25 = vmul.f32 0.35355338, %v599_v15 }
 0x136   : > { %v605_v19 = vadd.f32 %v604_v17, %v3451_v13  ;;  %v3467_v27 = vmul.f32 0.35355338, %v601_v18  ;;  %v3491_v18 = vpop.permute.xlu1 %376 }
 0x137   : > { %v3465_v26 = vmul.f32 0.35355338, %v603_v16  ;;  %4947 = vst [vmem:[#allocation7_spill] sm:$0xff] %v3491_v18 }
 0x138   : > { %v3469_v28 = vmul.f32 0.35355338, %v605_v19 }
 0x13a   : > { %v608_v29 = vpop.f32.mrb[8].mxu1 }
 0x13b   : > { %v609_v32 = vadd.f32 %v608_v29, %v3461_v24  ;;  %v610_v33 = vpop.f32.mrb[9].mxu1 }
 0x13c   : > { %v611_v36 = vadd.f32 %v610_v33, %v3461_v24  ;;  %v3481_v37 = vpop.f32.mrb[10].mxu1 }
 0x13d   : > { %v756_v38 = vmul.f32 %v3471_v30, %v609_v32  ;;  %v896_v39 = vmul.f32 %v3473_v31, %v609_v32  ;;  %v1036_v40 = vmul.f32 %v3463_v25, %v609_v32  ;;  %v1176_v41 = vmul.f32 %v3465_v26, %v609_v32  ;;  %v614_v42 = vpop.f32.mrb[11].mxu1 }
 0x13e   : > { %v757_v43 = vmul.f32 %v3476_v34, %v611_v36  ;;  %v897_v44 = vmul.f32 %v3478_v35, %v611_v36  ;;  %v1037_v45 = vmul.f32 %v3467_v27, %v611_v36  ;;  %v1177_v46 = vmul.f32 %v3469_v28, %v611_v36 }
 0x13f   : > { %v772_v47 = vrot.slane %v756_v38, 4  ;;  %v912_v48 = vrot.slane %v896_v39, 4  ;;  %v1052_v49 = vrot.slane %v1036_v40, 4  ;;  %v1192_v50 = vrot.slane %v1176_v41, 4 }
 0x140   : > { %v778_v51 = vrot.slane %v757_v43, 4  ;;  %v918_v52 = vrot.slane %v897_v44, 4  ;;  %v1058_v53 = vrot.slane %v1037_v45, 4  ;;  %v1198_v54 = vrot.slane %v1177_v46, 4 }
 0x141   : > { %v773_v55 = vadd.f32 %v772_v47, %v756_v38  ;;  %v913_v56 = vadd.f32 %v912_v48, %v896_v39  ;;  %v1053_v57 = vadd.f32 %v1052_v49, %v1036_v40  ;;  %v1193_v58 = vadd.f32 %v1192_v50, %v1176_v41 }
 0x142   : > { %v779_v59 = vadd.f32 %v778_v51, %v757_v43  ;;  %v919_v60 = vadd.f32 %v918_v52, %v897_v44  ;;  %v1059_v61 = vadd.f32 %v1058_v53, %v1037_v45  ;;  %v1199_v62 = vadd.f32 %v1198_v54, %v1177_v46  ;;  %v618_v63 = vpop.f32.mrb[12].mxu1  ;;  %v3497_v45 = vpop.permute.xlu0 %381 }
 0x143   : > { %v774_v1 = vrot.slane %v773_v55, 2  ;;  %v914_v2 = vrot.slane %v913_v56, 2  ;;  %v1054_v3 = vrot.slane %v1053_v57, 2  ;;  %v1194_v4 = vrot.slane %v1193_v58, 2  ;;  %v620_v0 = vpop.f32.mrb[13].mxu1  ;;  %4948 = vst [vmem:[#allocation8_spill] sm:$0xff] %v3497_v45  ;;  %v3499_v46 = vpop.permute.xlu1 %386 }
 0x144   : > { %v780_v5 = vrot.slane %v779_v59, 2  ;;  %v920_v6 = vrot.slane %v919_v60, 2  ;;  %v1060_v8 = vrot.slane %v1059_v61, 2  ;;  %v1200_v10 = vrot.slane %v1199_v62, 2  ;;  %v622_v12 = vpop.f32.mrb[14].mxu1  ;;  %4949 = vst [vmem:[#allocation9_spill] sm:$0xff] %v3499_v46 }
 0x145   : > { %v775_v14 = vadd.f32 %v774_v1, %v773_v55  ;;  %v915_v15 = vadd.f32 %v914_v2, %v913_v56  ;;  %v1055_v16 = vadd.f32 %v1054_v3, %v1053_v57  ;;  %v1195_v17 = vadd.f32 %v1194_v4, %v1193_v58  ;;  %v624_v19 = vpop.f32.mrb[15].mxu1 }
 0x146   : > { %v781_v20 = vadd.f32 %v780_v5, %v779_v59  ;;  %v921_v21 = vadd.f32 %v920_v6, %v919_v60  ;;  %v1061_v22 = vadd.f32 %v1060_v8, %v1059_v61  ;;  %v1201_v23 = vadd.f32 %v1200_v10, %v1199_v62 }
 0x147   : > { %v776_v29 = vrot.slane %v775_v14, 1  ;;  %v916_v32 = vrot.slane %v915_v15, 1  ;;  %v1056_v33 = vrot.slane %v1055_v16, 1  ;;  %v1196_v36 = vrot.slane %v1195_v17, 1 }
 0x148   : > { %v782_v38 = vrot.slane %v781_v20, 1  ;;  %v922_v39 = vrot.slane %v921_v21, 1  ;;  %v1062_v40 = vrot.slane %v1061_v22, 1  ;;  %v1202_v41 = vrot.slane %v1201_v23, 1 }
 0x149   : > { %v3493_v43 = vadd.f32 %v776_v29, %v775_v14  ;;  %v3495_v44 = vadd.f32 %v916_v32, %v915_v15  ;;  %v3501_v47 = vadd.f32 %v1056_v33, %v1055_v16  ;;  %v3503_v48 = vadd.f32 %v1196_v36, %v1195_v17 }
 0x14a   : > { %v3505_v49 = vadd.f32 %v782_v38, %v781_v20  ;;  %v3507_v50 = vadd.f32 %v922_v39, %v921_v21  ;;  %v3509_v51 = vpop.f32.mrb[16].mxu1  ;;  %v3511_v52 = vadd.f32 %v1062_v40, %v1061_v22  ;;  %v3513_v53 = vadd.f32 %v1202_v41, %v1201_v23 }
 0x14b   : > { %4950 = vst [vmem:[#allocation10_spill] sm:$0xff] %v3509_v51  ;;  %v613_v54 = vadd.f32 %v3481_v37, %v3491_v18  ;;  %v615_v55 = vadd.f32 %v614_v42, %v3491_v18  ;;  %v3518_v56 = vpop.f32.mrb[17].mxu1  ;;  %v3521_v57 = vadd.f32 %v618_v63, %v3497_v45  ;;  %v3524_v58 = vadd.f32 %v620_v0, %v3497_v45 }
 0x14c   : > { %4951 = vst [vmem:[#allocation11_spill] sm:$0xff] %v3518_v56  ;;  %v3527_v59 = vadd.f32 %v622_v12, %v3499_v46  ;;  %v3530_v60 = vadd.f32 %v624_v19, %v3499_v46  ;;  %v3532_v61 = vpop.f32.mrb[18].mxu1 }
 0x14d   : > { %4952 = vst [vmem:[#allocation12_spill] sm:$0xff] %v3532_v61  ;;  %v760_v37 = vmul.f32 %v3471_v30, %v613_v54  ;;  %v900_v42 = vmul.f32 %v3473_v31, %v613_v54  ;;  %v1040_v62 = vmul.f32 %v3463_v25, %v613_v54  ;;  %v1180_v63 = vmul.f32 %v3465_v26, %v613_v54  ;;  %v3538_v1 = vpop.f32.mrb[19].mxu1 }
 0x14e   : > { %4953 = vst [vmem:[#allocation13_spill] sm:$0xff] %v3538_v1  ;;  %v761_v2 = vmul.f32 %v3476_v34, %v615_v55  ;;  %v901_v3 = vmul.f32 %v3478_v35, %v615_v55  ;;  %v1041_v4 = vmul.f32 %v3467_v27, %v615_v55  ;;  %v1181_v0 = vmul.f32 %v3469_v28, %v615_v55 }
 0x14f   : > { %v796_v5 = vrot.slane %v760_v37, 4  ;;  %v936_v6 = vrot.slane %v900_v42, 4  ;;  %v1076_v8 = vrot.slane %v1040_v62, 4  ;;  %v1216_v10 = vrot.slane %v1180_v63, 4 }
 0x150   : > { %v802_v12 = vrot.slane %v761_v2, 4  ;;  %v942_v14 = vrot.slane %v901_v3, 4  ;;  %v1082_v15 = vrot.slane %v1041_v4, 4  ;;  %v1222_v16 = vrot.slane %v1181_v0, 4 }
 0x151   : > { %v797_v17 = vadd.f32 %v796_v5, %v760_v37  ;;  %v937_v19 = vadd.f32 %v936_v6, %v900_v42  ;;  %v1077_v20 = vadd.f32 %v1076_v8, %v1040_v62  ;;  %v1217_v21 = vadd.f32 %v1216_v10, %v1180_v63 }
 0x152   : > { %v803_v22 = vadd.f32 %v802_v12, %v761_v2  ;;  %v943_v23 = vadd.f32 %v942_v14, %v901_v3  ;;  %v1083_v29 = vadd.f32 %v1082_v15, %v1041_v4  ;;  %v1223_v32 = vadd.f32 %v1222_v16, %v1181_v0  ;;  %v3544_v33 = vpop.f32.mrb[20].mxu1 }
 0x153   : > { %4954 = vst [vmem:[#allocation14_spill] sm:$0xff] %v3544_v33  ;;  %v798_v36 = vrot.slane %v797_v17, 2  ;;  %v938_v38 = vrot.slane %v937_v19, 2  ;;  %v1078_v39 = vrot.slane %v1077_v20, 2  ;;  %v1218_v40 = vrot.slane %v1217_v21, 2  ;;  %v3546_v41 = vpop.f32.mrb[21].mxu1 }
 0x154   : > { %4955 = vst [vmem:[#allocation15_spill] sm:$0xff] %v3546_v41  ;;  %v804_v54 = vrot.slane %v803_v22, 2  ;;  %v944_v55 = vrot.slane %v943_v23, 2  ;;  %v1084_v46 = vrot.slane %v1083_v29, 2  ;;  %v1224_v1 = vrot.slane %v1223_v32, 2  ;;  %v3548_v37 = vpop.f32.mrb[22].mxu1 }
 0x155   : > { %4956 = vst [vmem:[#allocation16_spill] sm:$0xff] %v3548_v37  ;;  %v799_v42 = vadd.f32 %v798_v36, %v797_v17  ;;  %v939_v62 = vadd.f32 %v938_v38, %v937_v19  ;;  %v1079_v63 = vadd.f32 %v1078_v39, %v1077_v20  ;;  %v1219_v2 = vadd.f32 %v1218_v40, %v1217_v21  ;;  %v3550_v3 = vpop.f32.mrb[23].mxu1 }
 0x156   : > { %4957 = vst [vmem:[#allocation17_spill] sm:$0xff] %v3550_v3  ;;  %v805_v4 = vadd.f32 %v804_v54, %v803_v22  ;;  %v945_v0 = vadd.f32 %v944_v55, %v943_v23  ;;  %v1085_v5 = vadd.f32 %v1084_v46, %v1083_v29  ;;  %v1225_v6 = vadd.f32 %v1224_v1, %v1223_v32 }
 0x157   : > { %v800_v8 = vrot.slane %v799_v42, 1  ;;  %v940_v10 = vrot.slane %v939_v62, 1  ;;  %v1080_v12 = vrot.slane %v1079_v63, 1  ;;  %v1220_v14 = vrot.slane %v1219_v2, 1 }
 0x158   : > { %v806_v15 = vrot.slane %v805_v4, 1  ;;  %v946_v16 = vrot.slane %v945_v0, 1  ;;  %v1086_v41 = vrot.slane %v1085_v5, 1  ;;  %v1226_v33 = vrot.slane %v1225_v6, 1 }
 0x159   : > { %v3552_v45 = vadd.f32 %v800_v8, %v799_v42  ;;  %v3554_v17 = vadd.f32 %v940_v10, %v939_v62  ;;  %v3556_v19 = vadd.f32 %v1080_v12, %v1079_v63  ;;  %v3558_v20 = vadd.f32 %v1220_v14, %v1219_v2 }
 0x15a   : > { %v3560_v21 = vadd.f32 %v806_v15, %v805_v4  ;;  %v3562_v46 = vadd.f32 %v946_v16, %v945_v0  ;;  %v3564_v1 = vadd.f32 %v1086_v41, %v1085_v5  ;;  %v3566_v22 = vadd.f32 %v1226_v33, %v1225_v6 }
 0x15b   : > { %v764_v41 = vmul.f32 %v3471_v30, %v3521_v57  ;;  %v904_v54 = vmul.f32 %v3473_v31, %v3521_v57  ;;  %v1044_v55 = vmul.f32 %v3463_v25, %v3521_v57  ;;  %v1184_v42 = vmul.f32 %v3465_v26, %v3521_v57 }
 0x15c   : > { %4958 = vst [vmem:[#allocation18_spill] sm:$0xff] %v3566_v22  ;;  %v765_v62 = vmul.f32 %v3476_v34, %v3524_v58  ;;  %v905_v63 = vmul.f32 %v3478_v35, %v3524_v58  ;;  %v1045_v2 = vmul.f32 %v3467_v27, %v3524_v58  ;;  %v1185_v4 = vmul.f32 %v3469_v28, %v3524_v58 }
 0x15d   : > { %v820_v0 = vrot.slane %v764_v41, 4  ;;  %v960_v5 = vrot.slane %v904_v54, 4  ;;  %v1100_v6 = vrot.slane %v1044_v55, 4  ;;  %v1240_v8 = vrot.slane %v1184_v42, 4 }
 0x15e   : > { %v826_v10 = vrot.slane %v765_v62, 4  ;;  %v966_v12 = vrot.slane %v905_v63, 4  ;;  %v1106_v14 = vrot.slane %v1045_v2, 4  ;;  %v1246_v57 = vrot.slane %v1185_v4, 4 }
 0x15f   : > { %v821_v15 = vadd.f32 %v820_v0, %v764_v41  ;;  %v961_v16 = vadd.f32 %v960_v5, %v904_v54  ;;  %v1101_v40 = vadd.f32 %v1100_v6, %v1044_v55  ;;  %v1241_v33 = vadd.f32 %v1240_v8, %v1184_v42 }
 0x160   : > { %v827_v39 = vadd.f32 %v826_v10, %v765_v62  ;;  %v967_v38 = vadd.f32 %v966_v12, %v905_v63  ;;  %v1107_v36 = vadd.f32 %v1106_v14, %v1045_v2  ;;  %v1247_v32 = vadd.f32 %v1246_v57, %v1185_v4 }
 0x161   : > { %v822_v29 = vrot.slane %v821_v15, 2  ;;  %v962_v23 = vrot.slane %v961_v16, 2  ;;  %v1102_v3 = vrot.slane %v1101_v40, 2  ;;  %v1242_v58 = vrot.slane %v1241_v33, 2 }
 0x162   : > { %v828_v37 = vrot.slane %v827_v39, 2  ;;  %v968_v18 = vrot.slane %v967_v38, 2  ;;  %v1108_v24 = vrot.slane %v1107_v36, 2  ;;  %v1248_v13 = vrot.slane %v1247_v32, 2 }
 0x163   : > { %v823_v9 = vadd.f32 %v822_v29, %v821_v15  ;;  %v963_v11 = vadd.f32 %v962_v23, %v961_v16  ;;  %v1103_v61 = vadd.f32 %v1102_v3, %v1101_v40  ;;  %v1243_v7 = vadd.f32 %v1242_v58, %v1241_v33 }
 0x164   : > { %v829_v41 = vadd.f32 %v828_v37, %v827_v39  ;;  %v969_v54 = vadd.f32 %v968_v18, %v967_v38  ;;  %v1109_v55 = vadd.f32 %v1108_v24, %v1107_v36  ;;  %v1249_v42 = vadd.f32 %v1248_v13, %v1247_v32 }
 0x165   : > { %v824_v62 = vrot.slane %v823_v9, 1  ;;  %v964_v63 = vrot.slane %v963_v11, 1  ;;  %v1104_v2 = vrot.slane %v1103_v61, 1  ;;  %v1244_v4 = vrot.slane %v1243_v7, 1 }
 0x166   : > { %v830_v0 = vrot.slane %v829_v41, 1  ;;  %v970_v5 = vrot.slane %v969_v54, 1  ;;  %v1110_v6 = vrot.slane %v1109_v55, 1  ;;  %v1250_v8 = vrot.slane %v1249_v42, 1 }
 0x167   : > { %v3600_v10 = vadd.f32 %v824_v62, %v823_v9  ;;  %v3602_v12 = vadd.f32 %v964_v63, %v963_v11  ;;  %v3604_v29 = vadd.f32 %v1104_v2, %v1103_v61  ;;  %v3606_v3 = vadd.f32 %v1244_v4, %v1243_v7 }
 0x168   : > { %v3608_v37 = vadd.f32 %v830_v0, %v829_v41  ;;  %v3610_v24 = vadd.f32 %v970_v5, %v969_v54  ;;  %v3612_v13 = vadd.f32 %v1110_v6, %v1109_v55  ;;  %v3614_v18 = vadd.f32 %v1250_v8, %v1249_v42 }
 0x169   : > { %v4961_v9 = vmax.f32 %v3493_v43, %v3552_v45  ;;  %v4962_v7 = vmax.f32 %v3495_v44, %v3554_v17  ;;  %v4963_v32 = vmax.f32 %v3501_v47, %v3556_v19  ;;  %v4964_v38 = vmax.f32 %v3503_v48, %v3558_v20 }
 0x16a   : > { %4959 = vst [vmem:[#allocation19_spill] sm:$0xff] %v3614_v18  ;;  %v3616_v23 = vpop.f32.mrb[24].mxu1  ;;  %v4966_v40 = vmax.f32 %v3505_v49, %v3560_v21  ;;  %v4967_v57 = vmax.f32 %v3507_v50, %v3562_v46  ;;  %v4968_v16 = vmax.f32 %v3511_v52, %v3564_v1  ;;  %v4969_v41 = vmax.f32 %v3513_v53, %v3566_v22 }
 0x16b   : > { %4960 = vst [vmem:[#allocation20_spill] sm:$0xff] %v3616_v23  ;;  %v3622_v11 = vmax.f32 %v4961_v9, %v3600_v10  ;;  %v3628_v61 = vmax.f32 %v4962_v7, %v3602_v12  ;;  %v3634_v36 = vmax.f32 %v4963_v32, %v3604_v29  ;;  %v3640_v39 = vmax.f32 %v4964_v38, %v3606_v3  ;;  %v3642_v33 = vpop.f32.mrb[25].mxu1 }
 0x16c   : > { %4965 = vst [vmem:[#allocation21_spill] sm:$0xff] %v3642_v33  ;;  %v3648_v14 = vmax.f32 %v4966_v40, %v3608_v37  ;;  %v3654_v15 = vmax.f32 %v4967_v57, %v3610_v24  ;;  %v3660_v58 = vmax.f32 %v4968_v16, %v3612_v13  ;;  %v3666_v54 = vmax.f32 %v4969_v41, %v3614_v18  ;;  %v3668_v55 = vpop.f32.mrb[26].mxu1 }
 0x16d   : > { %4970 = vst [vmem:[#allocation22_spill] sm:$0xff] %v3668_v55  ;;  %v768_v42 = vmul.f32 %v3471_v30, %v3527_v59  ;;  %v908_v62 = vmul.f32 %v3473_v31, %v3527_v59  ;;  %v1048_v63 = vmul.f32 %v3463_v25, %v3527_v59  ;;  %v1188_v2 = vmul.f32 %v3465_v26, %v3527_v59  ;;  %v3678_v4 = vpop.f32.mrb[27].mxu1 }
 0x16e   : > { %4971 = vst [vmem:[#allocation23_spill] sm:$0xff] %v3678_v4  ;;  %v769_v0 = vmul.f32 %v3476_v34, %v3530_v60  ;;  %v909_v5 = vmul.f32 %v3478_v35, %v3530_v60  ;;  %v1049_v30 = vmul.f32 %v3467_v27, %v3530_v60  ;;  %v1189_v31 = vmul.f32 %v3469_v28, %v3530_v60 }
 0x16f   : > { %v844_v6 = vrot.slane %v768_v42, 4  ;;  %v984_v8 = vrot.slane %v908_v62, 4  ;;  %v1124_v25 = vrot.slane %v1048_v63, 4  ;;  %v1264_v9 = vrot.slane %v1188_v2, 4 }
 0x170   : > { %v850_v7 = vrot.slane %v769_v0, 4  ;;  %v990_v26 = vrot.slane %v909_v5, 4  ;;  %v1130_v59 = vrot.slane %v1049_v30, 4  ;;  %v1270_v32 = vrot.slane %v1189_v31, 4 }
 0x171   : > { %v845_v38 = vadd.f32 %v844_v6, %v768_v42  ;;  %v985_v40 = vadd.f32 %v984_v8, %v908_v62  ;;  %v1125_v34 = vadd.f32 %v1124_v25, %v1048_v63  ;;  %v1265_v57 = vadd.f32 %v1264_v9, %v1188_v2 }
 0x172   : > { %v851_v16 = vadd.f32 %v850_v7, %v769_v0  ;;  %v991_v35 = vadd.f32 %v990_v26, %v909_v5  ;;  %v1131_v41 = vadd.f32 %v1130_v59, %v1049_v30  ;;  %v1271_v4 = vadd.f32 %v1270_v32, %v1189_v31  ;;  %v3688_v27 = vpop.f32.mrb[28].mxu1 }
 0x173   : > { %4972 = vst [vmem:[#allocation24_spill] sm:$0xff] %v3688_v27  ;;  %v846_v55 = vrot.slane %v845_v38, 2  ;;  %v986_v28 = vrot.slane %v985_v40, 2  ;;  %v1126_v60 = vrot.slane %v1125_v34, 2  ;;  %v1266_v33 = vrot.slane %v1265_v57, 2  ;;  %v3690_v23 = vpop.f32.mrb[29].mxu1 }
 0x174   : > { %4973 = vst [vmem:[#allocation25_spill] sm:$0xff] %v3690_v23  ;;  %v852_v56 = vrot.slane %v851_v16, 2  ;;  %v992_v51 = vrot.slane %v991_v35, 2  ;;  %v1132_v18 = vrot.slane %v1131_v41, 2  ;;  %v1272_v22 = vrot.slane %v1271_v4, 2  ;;  %v3692_v42 = vpop.f32.mrb[30].mxu1 }
 0x175   : > { %4974 = vst [vmem:[#allocation26_spill] sm:$0xff] %v3692_v42  ;;  %v847_v62 = vadd.f32 %v846_v55, %v845_v38  ;;  %v987_v63 = vadd.f32 %v986_v28, %v985_v40  ;;  %v1127_v2 = vadd.f32 %v1126_v60, %v1125_v34  ;;  %v1267_v0 = vadd.f32 %v1266_v33, %v1265_v57  ;;  %v3694_v5 = vpop.f32.mrb[31].mxu1 }
 0x176   : > { %v853_v30 = vadd.f32 %v852_v56, %v851_v16  ;;  %v993_v31 = vadd.f32 %v992_v51, %v991_v35  ;;  %v1133_v6 = vadd.f32 %v1132_v18, %v1131_v41  ;;  %v1273_v8 = vadd.f32 %v1272_v22, %v1271_v4 }
 0x177   : > { %v848_v25 = vrot.slane %v847_v62, 1  ;;  %v988_v9 = vrot.slane %v987_v63, 1  ;;  %v1128_v7 = vrot.slane %v1127_v2, 1  ;;  %v1268_v26 = vrot.slane %v1267_v0, 1 }
 0x178   : > { %v854_v59 = vrot.slane %v853_v30, 1  ;;  %v994_v32 = vrot.slane %v993_v31, 1  ;;  %v1134_v23 = vrot.slane %v1133_v6, 1  ;;  %v1274_v27 = vrot.slane %v1273_v8, 1 }
 0x179   : > { %v849_v42 = vadd.f32 %v848_v25, %v847_v62  ;;  %v989_v55 = vadd.f32 %v988_v9, %v987_v63  ;;  %v1129_v38 = vadd.f32 %v1128_v7, %v1127_v2  ;;  %v3696_v40 = vadd.f32 %v1268_v26, %v1267_v0 }
 0x17a   : > { %v3698_v51 = vadd.f32 %v854_v59, %v853_v30  ;;  %v3700_v56 = vadd.f32 %v994_v32, %v993_v31  ;;  %v3702_v22 = vadd.f32 %v1134_v23, %v1133_v6  ;;  %v3704_v18 = vadd.f32 %v1274_v27, %v1273_v8  ;;  %v3706_v33 = vpop.f32.mrb[32].mxu1 }
 0x17b   : > { %v870_v4 = vmax.f32 %v3622_v11, %v849_v42  ;;  %v1010_v34 = vmax.f32 %v3628_v61, %v989_v55  ;;  %v1150_v57 = vmax.f32 %v3634_v36, %v1129_v38  ;;  %v1290_v16 = vmax.f32 %v3640_v39, %v3696_v40  ;;  %v3713_v35 = vpop.f32.mrb[33].mxu1 }
 0x17c   : > { %v3717_v23 = vmax.f32 %v3648_v14, %v3698_v51  ;;  %v3721_v41 = vmax.f32 %v3654_v15, %v3700_v56  ;;  %v3725_v11 = vmax.f32 %v3660_v58, %v3702_v22  ;;  %v3729_v61 = vmax.f32 %v3666_v54, %v3704_v18  ;;  %v3731_v36 = vpop.f32.mrb[34].mxu1 }
 0x17d   : > { %v880_v39 = vsub.f32 %v3493_v43, %v870_v4  ;;  %v884_v27 = vsub.f32 %v3552_v45, %v870_v4  ;;  %v888_v14 = vsub.f32 %v3600_v10, %v870_v4  ;;  %v892_v28 = vsub.f32 %v849_v42, %v870_v4  ;;  %v3736_v60 = vpop.f32.mrb[35].mxu1 }
 0x17e   : > { %v1020_v15 = vsub.f32 %v3495_v44, %v1010_v34  ;;  %v1024_v58 = vsub.f32 %v3554_v17, %v1010_v34  ;;  %v1028_v62 = vsub.f32 %v3602_v12, %v1010_v34  ;;  %v1032_v63 = vsub.f32 %v989_v55, %v1010_v34 }
 0x17f   : > { %v1160_v54 = vsub.f32 %v3501_v47, %v1150_v57  ;;  %v1164_v2 = vsub.f32 %v3556_v19, %v1150_v57  ;;  %v1168_v43 = vsub.f32 %v3604_v29, %v1150_v57  ;;  %v1172_v0 = vsub.f32 %v1129_v38, %v1150_v57 }
 0x180   : > { %v1300_v45 = vsub.f32 %v3503_v48, %v1290_v16  ;;  %v1304_v10 = vsub.f32 %v3558_v20, %v1290_v16  ;;  %v1308_v42 = vsub.f32 %v3606_v3, %v1290_v16  ;;  %v1312_v44 = vsub.f32 %v3696_v40, %v1290_v16 }
 0x181   : > { %v1332_v30 = vrot.slane %v884_v27, 7  ;;  %v1335_v17 = vrot.slane %v888_v14, 6  ;;  %v1338_v31 = vrot.slane %v892_v28, 5  ;;  %v1379_v12 = vrot.slane %v1020_v15, 4 }
 0x182   : > { %v1380_v6 = vrot.slane %v1024_v58, 3  ;;  %v1383_v8 = vrot.slane %v1028_v62, 2  ;;  %v1386_v47 = vrot.slane %v1032_v63, 1  ;;  %v1430_v25 = vrot.slane %v1164_v2, 7  ;;  %v3748_v19 = vpop.f32.mrb[36].mxu1 }
 0x183   : > { %v1334_v29 = vsel %vm1333_vm1, %v1332_v30, %v880_v39  ;;  %v1432_v9 = vrot.slane %v1168_v43, 6  ;;  %v1434_v48 = vrot.slane %v1172_v0, 5  ;;  %v1474_v7 = vrot.slane %v1300_v45, 4  ;;  %v3751_v20 = vpop.f32.mrb[37].mxu1 }
 0x184   : > { %v1337_v3 = vsel %vm1336_vm2, %v1335_v17, %v1334_v29  ;;  %v1382_v26 = vsel %vm1381_vm3, %v1380_v6, %v1379_v12  ;;  %v1431_v59 = vsel %vm1333_vm1, %v1430_v25, %v1160_v54  ;;  %v1475_v32 = vrot.slane %v1304_v10, 3  ;;  %v3756_v55 = vpop.f32.mrb[38].mxu1 }
 0x185   : > { %v1340_v38 = vsel %vm1339_vm4, %v1338_v31, %v1337_v3  ;;  %v1385_v40 = vsel %vm1384_vm5, %v1383_v8, %v1382_v26  ;;  %v1433_v4 = vsel %vm1336_vm2, %v1432_v9, %v1431_v59  ;;  %v1477_v34 = vrot.slane %v1308_v42, 2  ;;  %v3761_v57 = vpop.f32.mrb[39].mxu1  ;;  %v3811_v59 = vpop.permute.xlu0 %391 }
 0x186   : > { %v1388_v16 = vsel %vm1387_vm6, %v1386_v47, %v1385_v40  ;;  %v1435_v39 = vsel %vm1339_vm4, %v1434_v48, %v1433_v4  ;;  %v1476_v27 = vsel %vm1381_vm3, %v1475_v32, %v1474_v7  ;;  %v1479_v14 = vrot.slane %v1312_v44, 1 }
 0x187   : > { %v1478_v28 = vsel %vm1384_vm5, %v1477_v34, %v1476_v27  ;;  %v1507_v15 = vsel %vm1506_vm7, %v1340_v38, %v1388_v16  ;;  %v881_v58 = vsub.f32 %v3505_v49, %v3717_v23  ;;  %v885_v62 = vsub.f32 %v3560_v21, %v3717_v23 }
 0x188   : > { %v1480_v63 = vsel %vm1387_vm6, %v1479_v14, %v1478_v28  ;;  %v889_v54 = vsub.f32 %v3608_v37, %v3717_v23  ;;  %v893_v2 = vsub.f32 %v3698_v51, %v3717_v23  ;;  %v1021_v0 = vsub.f32 %v3507_v50, %v3721_v41  ;;  %v4980_v28 = vld [vmem:[#allocation10_spill] sm:$0xff] }
 0x189   : > { %v1511_v43 = vsel %vm1506_vm7, %v1435_v39, %v1480_v63  ;;  %v1025_v45 = vsub.f32 %v3562_v46, %v3721_v41  ;;  %v1029_v49 = vsub.f32 %v3610_v24, %v3721_v41  ;;  %v1515_v21 = vmul.f32 1.442695, %v1507_v15  ;;  %v3818_v39 = vpop.permute.xlu1 %396 }
 0x18a   : > { %v1033_v10 = vsub.f32 %v3700_v56, %v3721_v41  ;;  %v1161_v37 = vsub.f32 %v3511_v52, %v3725_v11  ;;  %v3788_v42 = vpop.f32.mrb[40].mxu1  ;;  %v1165_v51 = vsub.f32 %v3564_v1, %v3725_v11  ;;  %v1169_v50 = vsub.f32 %v3612_v13, %v3725_v11  ;;  %v4976_v56 = vld [vmem:[#allocation18_spill] sm:$0xff]  ;;  %v4977_v52 = vld [vmem:[#allocation19_spill] sm:$0xff] }
 0x18b   : > { %4975 = vst [vmem:[#allocation27_spill] sm:$0xff] %v3788_v42  ;;  %v1173_v46 = vsub.f32 %v3702_v22, %v3725_v11  ;;  %v1301_v24 = vsub.f32 %v3513_v53, %v3729_v61  ;;  %v1523_v23 = vmul.f32 1.442695, %v1511_v43  ;;  %v1305_v41 = vsub.f32 %v4976_v56, %v3729_v61  ;;  %4978 = vst [vmem:[#allocation18_spill] sm:$0xff] %v3811_v59  ;;  %v4993_v56 = vld [vmem:[#allocation24_spill] sm:$0xff] }
 0x18c   : > { %v1309_v44 = vsub.f32 %v4977_v52, %v3729_v61  ;;  %v1313_v30 = vsub.f32 %v3704_v18, %v3729_v61  ;;  %v1341_v1 = vrot.slane %v885_v62, 7  ;;  %v1343_v17 = vrot.slane %v889_v54, 6  ;;  %4979 = vst [vmem:[#allocation19_spill] sm:$0xff] %v3818_v39  ;;  %v4982_v62 = vld [vmem:[#allocation11_spill] sm:$0xff]  ;;  %v4984_v54 = vld [vmem:[#allocation2_spill] sm:$0xff]  ;;  %v4994_v52 = vld [vmem:[#allocation25_spill] sm:$0xff] }
 0x18d   : > { %v1345_v31 = vrot.slane %v893_v2, 5  ;;  %v1389_v13 = vrot.slane %v1021_v0, 4  ;;  %v1390_v12 = vrot.slane %v1025_v45, 3  ;;  %v1392_v6 = vrot.slane %v1029_v49, 2  ;;  %v4985_v2 = vld [vmem:[#allocation20_spill] sm:$0xff]  ;;  %v4988_v49 = vld [vmem:[#allocation21_spill] sm:$0xff] }
 0x18e   : > { %v1394_v22 = vrot.slane %v1033_v10, 1  ;;  %v1436_v11 = vrot.slane %v1165_v51, 7  ;;  %v1342_v53 = vsel %vm1333_vm1, %v1341_v1, %v881_v58  ;;  %v1438_v8 = vrot.slane %v1169_v50, 6  ;;  %v4986_v0 = vld [vmem:[#allocation12_spill] sm:$0xff] }
 0x18f   : > { %v1440_v47 = vrot.slane %v1173_v46, 5  ;;  %v1481_v25 = vrot.slane %v1301_v24, 4  ;;  %v1344_v29 = vsel %vm1336_vm2, %v1343_v17, %v1342_v53  ;;  %v1391_v9 = vsel %vm1381_vm3, %v1390_v12, %v1389_v13  ;;  %v4989_v10 = vld [vmem:[#allocation4_spill] sm:$0xff]  ;;  %v4991_v46 = vld [vmem:[#allocation23_spill] sm:$0xff]  ;;  %v4996_v13 = vld [vmem:[#allocation26_spill] sm:$0xff] }
 0x190   : > { %v1437_v48 = vsel %vm1333_vm1, %v1436_v11, %v1161_v37  ;;  %v1482_v18 = vrot.slane %v1305_v41, 3  ;;  %v1346_v61 = vsel %vm1339_vm4, %v1345_v31, %v1344_v29  ;;  %v1393_v7 = vsel %vm1384_vm5, %v1392_v6, %v1391_v9  ;;  %v4990_v37 = vld [vmem:[#allocation22_spill] sm:$0xff]  ;;  %v4995_v31 = vld [vmem:[#allocation5_spill] sm:$0xff]  ;;  %v4999_v9 = vld [vmem:[#allocation7_spill] sm:$0xff] }
 0x191   : > { %v1439_v3 = vsel %vm1336_vm2, %v1438_v8, %v1437_v48  ;;  %v1484_v26 = vrot.slane %v1309_v44, 2  ;;  %v1395_v32 = vsel %vm1387_vm6, %v1394_v22, %v1393_v7  ;;  %v1486_v4 = vrot.slane %v1313_v30, 1  ;;  %v5001_v7 = vld [vmem:[#allocation8_spill] sm:$0xff] }
 0x192   : > { %v1441_v38 = vsel %vm1339_vm4, %v1440_v47, %v1439_v3  ;;  %v1483_v40 = vsel %vm1381_vm3, %v1482_v18, %v1481_v25  ;;  %v1508_v16 = vsel %vm1506_vm7, %v1346_v61, %v1395_v32  ;;  %3147 = vpow2.f32 %v1515_v21  ;;  %v4998_v47 = vld [vmem:[#allocation6_spill] sm:$0xff] }
 0x193   : > { %v1485_v34 = vsel %vm1384_vm5, %v1484_v26, %v1483_v40  ;;  %v1517_v14 = vmul.f32 1.442695, %v1508_v16  ;;  %v3823_v15 = vadd.f32 %v4980_v28, %v3811_v59  ;;  %3149 = vpow2.f32 %v1523_v23  ;;  %v4992_v23 = vld [vmem:[#allocation3_spill] sm:$0xff] }
 0x194   : > { %v1487_v27 = vsel %vm1387_vm6, %v1486_v4, %v1485_v34  ;;  %v3828_v63 = vadd.f32 %v4982_v62, %v3811_v59  ;;  %v682_v43 = vadd.f32 %v4985_v2, %v4984_v54  ;;  %v3834_v45 = vadd.f32 %v4986_v0, %v3818_v39 }
 0x195   : > { %4981 = vst [vmem:[#allocation10_spill] sm:$0xff] %v3823_v15  ;;  %v1512_v58 = vsel %vm1506_vm7, %v1441_v38, %v1487_v27  ;;  %3151 = vpow2.f32 %v1517_v14  ;;  %v684_v21 = vadd.f32 %v4988_v49, %v4984_v54  ;;  %v686_v51 = vadd.f32 %v4990_v37, %v4989_v10 }
 0x196   : > { %4983 = vst [vmem:[#allocation11_spill] sm:$0xff] %v3828_v63  ;;  %4987 = vst [vmem:[#allocation2_spill] sm:$0xff] %v3834_v45  ;;  %v3840_v50 = vmul.f32 1.442695, %v1512_v58  ;;  %v688_v24 = vadd.f32 %v4991_v46, %v4989_v10  ;;  %v692_v41 = vadd.f32 %v4993_v56, %v4992_v23  ;;  %v694_v44 = vadd.f32 %v4994_v52, %v4992_v23 }
 0x197   : > { %v3848_v30 = vmul.f32 0.35355338, %v682_v43  ;;  %v3850_v1 = vmul.f32 0.35355338, %v684_v21  ;;  %v3852_v17 = vmul.f32 0.35355338, %v686_v51  ;;  %v696_v12 = vadd.f32 %v4996_v13, %v4995_v31 }
 0x198   : > { %v3856_v6 = vmul.f32 0.35355338, %v688_v24  ;;  %v3858_v22 = vmul.f32 0.35355338, %v692_v41  ;;  %v3860_v11 = vmul.f32 0.35355338, %v694_v44  ;;  %v698_v53 = vadd.f32 %v3694_v5, %v4995_v31 }
 0x199   : > { %v3864_v8 = vmul.f32 0.35355338, %v696_v12  ;;  %v702_v25 = vadd.f32 %v3706_v33, %v4998_v47  ;;  %v704_v29 = vadd.f32 %v3713_v35, %v4998_v47  ;;  %v3872_v48 = vadd.f32 %v3731_v36, %v4999_v9 }
 0x19a   : > { %4997 = vst [vmem:[#allocation20_spill] sm:$0xff] %v3860_v11  ;;  %v3874_v18 = vmul.f32 0.35355338, %v698_v53  ;;  %v3878_v61 = vadd.f32 %v3736_v60, %v4999_v9  ;;  %v3882_v5 = vadd.f32 %v3748_v19, %v5001_v7  ;;  %v3886_v33 = vadd.f32 %v3751_v20, %v5001_v7 }
 0x19b   : > { %v758_v35 = vmul.f32 %v3848_v30, %v702_v25  ;;  %v898_v3 = vmul.f32 %v3852_v17, %v702_v25  ;;  %v1038_v36 = vmul.f32 %v3858_v22, %v702_v25  ;;  %v1178_v26 = vmul.f32 %v3864_v8, %v702_v25 }
 0x19c   : > { %5000 = vst [vmem:[#allocation12_spill] sm:$0xff] %v3874_v18  ;;  %v759_v32 = vmul.f32 %v3850_v1, %v704_v29  ;;  %v899_v60 = vmul.f32 %v3856_v6, %v704_v29  ;;  %v1039_v38 = vmul.f32 %v3860_v11, %v704_v29  ;;  %v1179_v19 = vmul.f32 %v3874_v18, %v704_v29  ;;  %v3896_v40 = vpop.eup %3147 }
 0x19d   : > { %5002 = vst [vmem:[#allocation21_spill] sm:$0xff] %v3896_v40  ;;  %v784_v20 = vrot.slane %v758_v35, 4  ;;  %v924_v4 = vrot.slane %v898_v3, 4  ;;  %v1064_v34 = vrot.slane %v1038_v36, 4  ;;  %v1204_v16 = vrot.slane %v1178_v26, 4  ;;  %v3898_v27 = vpop.eup %3149 }
 0x19e   : > { %5003 = vst [vmem:[#allocation4_spill] sm:$0xff] %v3898_v27  ;;  %v790_v14 = vrot.slane %v759_v32, 4  ;;  %v930_v28 = vrot.slane %v899_v60, 4  ;;  %v1070_v58 = vrot.slane %v1039_v38, 4  ;;  %v1210_v62 = vrot.slane %v1179_v19, 4 }
 0x19f   : > { %v3900_v54 = vpop.eup %3151  ;;  %v785_v2 = vadd.f32 %v784_v20, %v758_v35  ;;  %v925_v43 = vadd.f32 %v924_v4, %v898_v3  ;;  %v1065_v0 = vadd.f32 %v1064_v34, %v1038_v36  ;;  %v1205_v49 = vadd.f32 %v1204_v16, %v1178_v26 }
 0x1a0   : > { %5004 = vst [vmem:[#allocation22_spill] sm:$0xff] %v3900_v54  ;;  %v791_v21 = vadd.f32 %v790_v14, %v759_v32  ;;  %v931_v10 = vadd.f32 %v930_v28, %v899_v60  ;;  %v1071_v37 = vadd.f32 %v1070_v58, %v1039_v38  ;;  %v1211_v51 = vadd.f32 %v1210_v62, %v1179_v19 }
 0x1a1   : > { %v786_v46 = vrot.slane %v785_v2, 2  ;;  %v926_v24 = vrot.slane %v925_v43, 2  ;;  %v1066_v23 = vrot.slane %v1065_v0, 2  ;;  %v1206_v56 = vrot.slane %v1205_v49, 2 }
 0x1a2   : > { %v792_v41 = vrot.slane %v791_v21, 2  ;;  %v932_v52 = vrot.slane %v931_v10, 2  ;;  %v1072_v44 = vrot.slane %v1071_v37, 2  ;;  %v1212_v31 = vrot.slane %v1211_v51, 2 }
 0x1a3   : > { %v787_v13 = vadd.f32 %v786_v46, %v785_v2  ;;  %v927_v12 = vadd.f32 %v926_v24, %v925_v43  ;;  %v1067_v53 = vadd.f32 %v1066_v23, %v1065_v0  ;;  %v1207_v47 = vadd.f32 %v1206_v56, %v1205_v49  ;;  %v3934_v46 = vpop.f32.mrb[41].mxu1 }
 0x1a4   : > { %v793_v25 = vadd.f32 %v792_v41, %v791_v21  ;;  %v933_v29 = vadd.f32 %v932_v52, %v931_v10  ;;  %v1073_v9 = vadd.f32 %v1072_v44, %v1071_v37  ;;  %v1213_v7 = vadd.f32 %v1212_v31, %v1211_v51  ;;  %5006 = vst [vmem:[#allocation3_spill] sm:$0xff] %v3934_v46  ;;  %v3936_v52 = vpop.f32.mrb[42].mxu1 }
 0x1a5   : > { %v788_v35 = vrot.slane %v787_v13, 1  ;;  %v928_v3 = vrot.slane %v927_v12, 1  ;;  %v1068_v36 = vrot.slane %v1067_v53, 1  ;;  %v1208_v26 = vrot.slane %v1207_v47, 1  ;;  %5007 = vst [vmem:[#allocation24_spill] sm:$0xff] %v3936_v52 }
 0x1a6   : > { %v794_v32 = vrot.slane %v793_v25, 1  ;;  %v934_v60 = vrot.slane %v933_v29, 1  ;;  %v1074_v38 = vrot.slane %v1073_v9, 1  ;;  %v1214_v19 = vrot.slane %v1213_v7, 1 }
 0x1a7   : > { %v3902_v20 = vadd.f32 %v788_v35, %v787_v13  ;;  %v3904_v4 = vadd.f32 %v928_v3, %v927_v12  ;;  %v3906_v34 = vadd.f32 %v1068_v36, %v1067_v53  ;;  %v3908_v16 = vadd.f32 %v1208_v26, %v1207_v47  ;;  %v3938_v12 = vpop.f32.mrb[43].mxu1 }
 0x1a8   : > { %v3910_v14 = vadd.f32 %v794_v32, %v793_v25  ;;  %v3912_v28 = vadd.f32 %v934_v60, %v933_v29  ;;  %v3914_v58 = vadd.f32 %v1074_v38, %v1073_v9  ;;  %v3916_v62 = vadd.f32 %v1214_v19, %v1213_v7  ;;  %5008 = vst [vmem:[#allocation25_spill] sm:$0xff] %v3938_v12 }
 0x1a9   : > { %v762_v2 = vmul.f32 %v3848_v30, %v3872_v48  ;;  %v902_v43 = vmul.f32 %v3852_v17, %v3872_v48  ;;  %v1042_v0 = vmul.f32 %v3858_v22, %v3872_v48  ;;  %v1182_v49 = vmul.f32 %v3864_v8, %v3872_v48 }
 0x1aa   : > { %5005 = vst [vmem:[#allocation23_spill] sm:$0xff] %v3916_v62  ;;  %v763_v21 = vmul.f32 %v3850_v1, %v3878_v61  ;;  %v903_v10 = vmul.f32 %v3856_v6, %v3878_v61  ;;  %v1043_v37 = vmul.f32 %v3860_v11, %v3878_v61  ;;  %v1183_v51 = vmul.f32 %v3874_v18, %v3878_v61 }
 0x1ab   : > { %v808_v24 = vrot.slane %v762_v2, 4  ;;  %v948_v23 = vrot.slane %v902_v43, 4  ;;  %v1088_v56 = vrot.slane %v1042_v0, 4  ;;  %v1228_v41 = vrot.slane %v1182_v49, 4 }
 0x1ac   : > { %v814_v48 = vrot.slane %v763_v21, 4  ;;  %v954_v44 = vrot.slane %v903_v10, 4  ;;  %v1094_v31 = vrot.slane %v1043_v37, 4  ;;  %v1234_v13 = vrot.slane %v1183_v51, 4 }
 0x1ad   : > { %v809_v53 = vadd.f32 %v808_v24, %v762_v2  ;;  %v949_v47 = vadd.f32 %v948_v23, %v902_v43  ;;  %v1089_v25 = vadd.f32 %v1088_v56, %v1042_v0  ;;  %v1229_v29 = vadd.f32 %v1228_v41, %v1182_v49  ;;  %v3940_v2 = vpop.f32.mrb[44].mxu1 }
 0x1ae   : > { %v815_v9 = vadd.f32 %v814_v48, %v763_v21  ;;  %v955_v61 = vadd.f32 %v954_v44, %v903_v10  ;;  %v1095_v7 = vadd.f32 %v1094_v31, %v1043_v37  ;;  %v1235_v35 = vadd.f32 %v1234_v13, %v1183_v51  ;;  %5009 = vst [vmem:[#allocation5_spill] sm:$0xff] %v3940_v2  ;;  %v3942_v10 = vpop.f32.mrb[45].mxu1 }
 0x1af   : > { %v810_v3 = vrot.slane %v809_v53, 2  ;;  %v950_v36 = vrot.slane %v949_v47, 2  ;;  %v1090_v26 = vrot.slane %v1089_v25, 2  ;;  %v1230_v32 = vrot.slane %v1229_v29, 2  ;;  %5010 = vst [vmem:[#allocation26_spill] sm:$0xff] %v3942_v10  ;;  %v3944_v56 = vpop.f32.mrb[46].mxu1 }
 0x1b0   : > { %v816_v60 = vrot.slane %v815_v9, 2  ;;  %v956_v38 = vrot.slane %v955_v61, 2  ;;  %v1096_v19 = vrot.slane %v1095_v7, 2  ;;  %v1236_v45 = vrot.slane %v1235_v35, 2  ;;  %5011 = vst [vmem:[#allocation6_spill] sm:$0xff] %v3944_v56  ;;  %v3946_v13 = vpop.f32.mrb[47].mxu1 }
 0x1b1   : > { %v811_v15 = vadd.f32 %v810_v3, %v809_v53  ;;  %v951_v63 = vadd.f32 %v950_v36, %v949_v47  ;;  %v1091_v52 = vadd.f32 %v1090_v26, %v1089_v25  ;;  %v1231_v12 = vadd.f32 %v1230_v32, %v1229_v29  ;;  %5012 = vst [vmem:[#allocation7_spill] sm:$0xff] %v3946_v13 }
 0x1b2   : > { %v817_v43 = vadd.f32 %v816_v60, %v815_v9  ;;  %v957_v0 = vadd.f32 %v956_v38, %v955_v61  ;;  %v1097_v49 = vadd.f32 %v1096_v19, %v1095_v7  ;;  %v1237_v21 = vadd.f32 %v1236_v45, %v1235_v35 }
 0x1b3   : > { %v812_v37 = vrot.slane %v811_v15, 1  ;;  %v952_v51 = vrot.slane %v951_v63, 1  ;;  %v1092_v24 = vrot.slane %v1091_v52, 1  ;;  %v1232_v23 = vrot.slane %v1231_v12, 1 }
 0x1b4   : > { %v818_v41 = vrot.slane %v817_v43, 1  ;;  %v958_v48 = vrot.slane %v957_v0, 1  ;;  %v1098_v44 = vrot.slane %v1097_v49, 1  ;;  %v1238_v31 = vrot.slane %v1237_v21, 1 }
 0x1b5   : > { %v3948_v53 = vadd.f32 %v812_v37, %v811_v15  ;;  %v3950_v47 = vadd.f32 %v952_v51, %v951_v63  ;;  %v3952_v25 = vadd.f32 %v1092_v24, %v1091_v52  ;;  %v3954_v45 = vadd.f32 %v1232_v23, %v1231_v12 }
 0x1b6   : > { %v3956_v29 = vadd.f32 %v818_v41, %v817_v43  ;;  %v3958_v9 = vadd.f32 %v958_v48, %v957_v0  ;;  %v3960_v61 = vadd.f32 %v1098_v44, %v1097_v49  ;;  %v3962_v7 = vadd.f32 %v1238_v31, %v1237_v21 }
 0x1b7   : > { %v766_v32 = vmul.f32 %v3848_v30, %v3882_v5  ;;  %v906_v60 = vmul.f32 %v3852_v17, %v3882_v5  ;;  %v1046_v38 = vmul.f32 %v3858_v22, %v3882_v5  ;;  %v1186_v19 = vmul.f32 %v3864_v8, %v3882_v5 }
 0x1b8   : > { %5013 = vst [vmem:[#allocation8_spill] sm:$0xff] %v3962_v7  ;;  %v767_v43 = vmul.f32 %v3850_v1, %v3886_v33  ;;  %v907_v0 = vmul.f32 %v3856_v6, %v3886_v33  ;;  %v1047_v49 = vmul.f32 %v3860_v11, %v3886_v33  ;;  %v1187_v21 = vmul.f32 %v3874_v18, %v3886_v33 }
 0x1b9   : > { %v832_v37 = vrot.slane %v766_v32, 4  ;;  %v972_v51 = vrot.slane %v906_v60, 4  ;;  %v1112_v24 = vrot.slane %v1046_v38, 4  ;;  %v1252_v23 = vrot.slane %v1186_v19, 4 }
 0x1ba   : > { %v838_v41 = vrot.slane %v767_v43, 4  ;;  %v978_v48 = vrot.slane %v907_v0, 4  ;;  %v1118_v44 = vrot.slane %v1047_v49, 4  ;;  %v1258_v5 = vrot.slane %v1187_v21, 4 }
 0x1bb   : > { %v833_v31 = vadd.f32 %v832_v37, %v766_v32  ;;  %v973_v26 = vadd.f32 %v972_v51, %v906_v60  ;;  %v1113_v36 = vadd.f32 %v1112_v24, %v1046_v38  ;;  %v1253_v3 = vadd.f32 %v1252_v23, %v1186_v19 }
 0x1bc   : > { %v839_v12 = vadd.f32 %v838_v41, %v767_v43  ;;  %v979_v52 = vadd.f32 %v978_v48, %v907_v0  ;;  %v1119_v63 = vadd.f32 %v1118_v44, %v1047_v49  ;;  %v1259_v15 = vadd.f32 %v1258_v5, %v1187_v21 }
 0x1bd   : > { %v834_v35 = vrot.slane %v833_v31, 2  ;;  %v974_v13 = vrot.slane %v973_v26, 2  ;;  %v1114_v56 = vrot.slane %v1113_v36, 2  ;;  %v1254_v33 = vrot.slane %v1253_v3, 2 }
 0x1be   : > { %v840_v10 = vrot.slane %v839_v12, 2  ;;  %v980_v2 = vrot.slane %v979_v52, 2  ;;  %v1120_v46 = vrot.slane %v1119_v63, 2  ;;  %v1260_v42 = vrot.slane %v1259_v15, 2 }
 0x1bf   : > { %v835_v59 = vadd.f32 %v834_v35, %v833_v31  ;;  %v975_v27 = vadd.f32 %v974_v13, %v973_v26  ;;  %v1115_v18 = vadd.f32 %v1114_v56, %v1113_v36  ;;  %v1255_v11 = vadd.f32 %v1254_v33, %v1253_v3  ;;  %v4012_v13 = vpop.permute.xlu1 %406 }
 0x1c0   : > { %v841_v32 = vadd.f32 %v840_v10, %v839_v12  ;;  %v981_v60 = vadd.f32 %v980_v2, %v979_v52  ;;  %v1121_v38 = vadd.f32 %v1120_v46, %v1119_v63  ;;  %v1261_v19 = vadd.f32 %v1260_v42, %v1259_v15  ;;  %5016 = vst [vmem:[#allocation30_spill] sm:$0xff] %v4012_v13 }
 0x1c1   : > { %v836_v43 = vrot.slane %v835_v59, 1  ;;  %v976_v0 = vrot.slane %v975_v27, 1  ;;  %v1116_v49 = vrot.slane %v1115_v18, 1  ;;  %v1256_v21 = vrot.slane %v1255_v11, 1 }
 0x1c2   : > { %v842_v37 = vrot.slane %v841_v32, 1  ;;  %v982_v51 = vrot.slane %v981_v60, 1  ;;  %v1122_v24 = vrot.slane %v1121_v38, 1  ;;  %v1262_v23 = vrot.slane %v1261_v19, 1 }
 0x1c3   : > { %v3996_v41 = vadd.f32 %v836_v43, %v835_v59  ;;  %v3998_v48 = vadd.f32 %v976_v0, %v975_v27  ;;  %v4000_v35 = vadd.f32 %v1116_v49, %v1115_v18  ;;  %v4002_v56 = vadd.f32 %v1256_v21, %v1255_v11  ;;  %v5029_v21 = vld [vmem:[#allocation16_spill] sm:$0xff] }
 0x1c4   : > { %v4004_v10 = vadd.f32 %v842_v37, %v841_v32  ;;  %v4006_v46 = vadd.f32 %v982_v51, %v981_v60  ;;  %v4008_v42 = vadd.f32 %v1122_v24, %v1121_v38  ;;  %v4010_v2 = vadd.f32 %v1262_v23, %v1261_v19  ;;  %v5025_v60 = vld [vmem:[#allocation13_spill] sm:$0xff] }
 0x1c5   : > { %v5017_v59 = vmax.f32 %v3902_v20, %v3948_v53  ;;  %v5018_v11 = vmax.f32 %v3904_v4, %v3950_v47  ;;  %v5019_v15 = vmax.f32 %v3906_v34, %v3952_v25  ;;  %v5020_v52 = vmax.f32 %v3908_v16, %v3954_v45  ;;  %v5027_v19 = vld [vmem:[#allocation9_spill] sm:$0xff] }
 0x1c6   : > { %5014 = vst [vmem:[#allocation28_spill] sm:$0xff] %v4008_v42  ;;  %5015 = vst [vmem:[#allocation29_spill] sm:$0xff] %v4010_v2  ;;  %v5021_v3 = vmax.f32 %v3910_v14, %v3956_v29  ;;  %v5022_v26 = vmax.f32 %v3912_v28, %v3958_v9  ;;  %v5023_v5 = vmax.f32 %v3914_v58, %v3960_v61  ;;  %v4072_v49 = vsel %vm1506_vm7, %v3896_v40, 0.0 }
 0x1c7   : > { %v4018_v27 = vmax.f32 %v5017_v59, %v3996_v41  ;;  %v4024_v18 = vmax.f32 %v5018_v11, %v3998_v48  ;;  %v4030_v63 = vmax.f32 %v5019_v15, %v4000_v35  ;;  %v4036_v12 = vmax.f32 %v5020_v52, %v4002_v56  ;;  %5028 = vst [vmem:[#allocation9_spill] sm:$0xff] %v4072_v49  ;;  %v5032_v15 = vld [vmem:[#allocation20_spill] sm:$0xff] }
 0x1c8   : > { %v4042_v36 = vmax.f32 %v5021_v3, %v4004_v10  ;;  %v4048_v44 = vmax.f32 %v5022_v26, %v4006_v46  ;;  %v4054_v31 = vmax.f32 %v5023_v5, %v4008_v42  ;;  %v5024_v33 = vmax.f32 %v3916_v62, %v3962_v7  ;;  %v5033_v3 = vld [vmem:[#allocation12_spill] sm:$0xff] }
 0x1c9   : > { %v4064_v38 = vadd.f32 %v5025_v60, %v3818_v39  ;;  %v716_v43 = vadd.f32 %v3756_v55, %v5027_v19  ;;  %v718_v0 = vadd.f32 %v3761_v57, %v5027_v19  ;;  %3153 = vpow2.f32 %v3840_v50 }
 0x1ca   : > { %v4060_v32 = vmax.f32 %v5024_v33, %v4010_v2  ;;  %v4077_v37 = vadd.f32 %v5029_v21, %v4012_v13  ;;  %v4082_v24 = vsel %vm1506_vm7, %v3900_v54, 0.0 }
 0x1cb   : > { %5026 = vst [vmem:[#allocation13_spill] sm:$0xff] %v4064_v38  ;;  %5031 = vst [vmem:[#allocation31_spill] sm:$0xff] %v4082_v24  ;;  %v770_v55 = vmul.f32 %v3848_v30, %v716_v43  ;;  %v910_v57 = vmul.f32 %v3852_v17, %v716_v43  ;;  %v1050_v23 = vmul.f32 %v3858_v22, %v716_v43 }
 0x1cc   : > { %5030 = vst [vmem:[#allocation16_spill] sm:$0xff] %v4077_v37  ;;  %v1190_v59 = vmul.f32 %v3864_v8, %v716_v43  ;;  %v771_v50 = vmul.f32 %v3850_v1, %v718_v0  ;;  %v911_v11 = vmul.f32 %v3856_v6, %v718_v0  ;;  %v1051_v52 = vmul.f32 %v5032_v15, %v718_v0 }
 0x1cd   : > { %v1191_v26 = vmul.f32 %v5033_v3, %v718_v0  ;;  %v856_v5 = vrot.slane %v770_v55, 4  ;;  %v996_v33 = vrot.slane %v910_v57, 4  ;;  %v1136_v60 = vrot.slane %v1050_v23, 4 }
 0x1ce   : > { %v1276_v19 = vrot.slane %v1190_v59, 4  ;;  %v862_v21 = vrot.slane %v771_v50, 4  ;;  %v1002_v30 = vrot.slane %v911_v11, 4  ;;  %v1142_v51 = vrot.slane %v1051_v52, 4 }
 0x1cf   : > { %v1282_v17 = vrot.slane %v1191_v26, 4  ;;  %v857_v37 = vadd.f32 %v856_v5, %v770_v55  ;;  %v997_v22 = vadd.f32 %v996_v33, %v910_v57  ;;  %v1137_v38 = vadd.f32 %v1136_v60, %v1050_v23 }
 0x1d0   : > { %v1277_v8 = vadd.f32 %v1276_v19, %v1190_v59  ;;  %v863_v43 = vadd.f32 %v862_v21, %v771_v50  ;;  %v1003_v1 = vadd.f32 %v1002_v30, %v911_v11  ;;  %v1143_v39 = vadd.f32 %v1142_v51, %v1051_v52 }
 0x1d1   : > { %v1283_v6 = vadd.f32 %v1282_v17, %v1191_v26  ;;  %v858_v13 = vrot.slane %v857_v37, 2  ;;  %v998_v15 = vrot.slane %v997_v22, 2  ;;  %v1138_v54 = vrot.slane %v1137_v38, 2 }
 0x1d2   : > { %v1278_v0 = vrot.slane %v1277_v8, 2  ;;  %v864_v3 = vrot.slane %v863_v43, 2  ;;  %v1004_v40 = vrot.slane %v1003_v1, 2  ;;  %v1144_v24 = vrot.slane %v1143_v39, 2 }
 0x1d3   : > { %v1284_v49 = vrot.slane %v1283_v6, 2  ;;  %v859_v2 = vadd.f32 %v858_v13, %v857_v37  ;;  %v999_v7 = vadd.f32 %v998_v15, %v997_v22  ;;  %v1139_v62 = vadd.f32 %v1138_v54, %v1137_v38  ;;  %v4092_v55 = vpop.eup %3153 }
 0x1d4   : > { %v1279_v42 = vadd.f32 %v1278_v0, %v1277_v8  ;;  %v865_v57 = vadd.f32 %v864_v3, %v863_v43  ;;  %v1005_v23 = vadd.f32 %v1004_v40, %v1003_v1  ;;  %v1145_v59 = vadd.f32 %v1144_v24, %v1143_v39 }
 0x1d5   : > { %v1285_v50 = vadd.f32 %v1284_v49, %v1283_v6  ;;  %v860_v51 = vrot.slane %v859_v2, 1  ;;  %v1000_v11 = vrot.slane %v999_v7, 1  ;;  %v1140_v52 = vrot.slane %v1139_v62, 1 }
 0x1d6   : > { %v1280_v26 = vrot.slane %v1279_v42, 1  ;;  %v866_v5 = vrot.slane %v865_v57, 1  ;;  %v1006_v33 = vrot.slane %v1005_v23, 1  ;;  %v1146_v60 = vrot.slane %v1145_v59, 1 }
 0x1d7   : > { %v1286_v19 = vrot.slane %v1285_v50, 1  ;;  %v861_v21 = vadd.f32 %v860_v51, %v859_v2  ;;  %v1001_v30 = vadd.f32 %v1000_v11, %v999_v7  ;;  %v1141_v13 = vadd.f32 %v1140_v52, %v1139_v62 }
 0x1d8   : > { %v1281_v37 = vadd.f32 %v1280_v26, %v1279_v42  ;;  %v4094_v54 = vadd.f32 %v866_v5, %v865_v57  ;;  %v4096_v38 = vadd.f32 %v1006_v33, %v1005_v23  ;;  %v4098_v17 = vadd.f32 %v1146_v60, %v1145_v59 }
 0x1d9   : > { %v4100_v39 = vadd.f32 %v1286_v19, %v1285_v50  ;;  %v876_v40 = vmax.f32 %v4018_v27, %v861_v21  ;;  %v1016_v49 = vmax.f32 %v4024_v18, %v1001_v30  ;;  %v1156_v24 = vmax.f32 %v4030_v63, %v1141_v13 }
 0x1da   : > { %v1296_v22 = vmax.f32 %v4036_v12, %v1281_v37  ;;  %v4108_v62 = vmax.f32 %v4042_v36, %v4094_v54  ;;  %v4112_v7 = vmax.f32 %v4048_v44, %v4096_v38  ;;  %v4116_v42 = vmax.f32 %v4054_v31, %v4098_v17 }
 0x1db   : > { %v4120_v2 = vmax.f32 %v4060_v32, %v4100_v39  ;;  %v882_v27 = vsub.f32 %v3902_v20, %v876_v40  ;;  %v886_v18 = vsub.f32 %v3948_v53, %v876_v40  ;;  %v890_v63 = vsub.f32 %v3996_v41, %v876_v40 }
 0x1dc   : > { %v894_v12 = vsub.f32 %v861_v21, %v876_v40  ;;  %v1022_v36 = vsub.f32 %v3904_v4, %v1016_v49  ;;  %v1026_v44 = vsub.f32 %v3950_v47, %v1016_v49  ;;  %v1030_v8 = vsub.f32 %v3998_v48, %v1016_v49 }
 0x1dd   : > { %v1034_v43 = vsub.f32 %v1001_v30, %v1016_v49  ;;  %v1162_v31 = vsub.f32 %v3906_v34, %v1156_v24  ;;  %v1166_v1 = vsub.f32 %v3952_v25, %v1156_v24  ;;  %v1170_v32 = vsub.f32 %v4000_v35, %v1156_v24 }
 0x1de   : > { %v1174_v6 = vsub.f32 %v1141_v13, %v1156_v24  ;;  %v1302_v20 = vsub.f32 %v3908_v16, %v1296_v22  ;;  %v1306_v53 = vsub.f32 %v3954_v45, %v1296_v22  ;;  %v1310_v41 = vsub.f32 %v4002_v56, %v1296_v22 }
 0x1df   : > { %v1314_v15 = vsub.f32 %v1281_v37, %v1296_v22  ;;  %v1347_v4 = vrot.slane %v886_v18, 7  ;;  %v1349_v0 = vrot.slane %v890_v63, 6  ;;  %v1351_v47 = vrot.slane %v894_v12, 5 }
 0x1e0   : > { %v1396_v3 = vrot.slane %v1022_v36, 4  ;;  %v1397_v48 = vrot.slane %v1026_v44, 3  ;;  %v1399_v57 = vrot.slane %v1030_v8, 2  ;;  %v1401_v23 = vrot.slane %v1034_v43, 1  ;;  %v5035_v44 = vld [vmem:[#allocation23_spill] sm:$0xff]  ;;  %v5036_v8 = vld [vmem:[#allocation8_spill] sm:$0xff] }
 0x1e1   : > { %v1442_v34 = vrot.slane %v1166_v1, 7  ;;  %v1348_v25 = vsel %vm1333_vm1, %v1347_v4, %v882_v27  ;;  %v1444_v59 = vrot.slane %v1170_v32, 6  ;;  %v1446_v35 = vrot.slane %v1174_v6, 5 }
 0x1e2   : > { %v1488_v50 = vrot.slane %v1302_v20, 4  ;;  %v1350_v16 = vsel %vm1336_vm2, %v1349_v0, %v1348_v25  ;;  %v1398_v45 = vsel %vm1381_vm3, %v1397_v48, %v1396_v3  ;;  %v1489_v51 = vrot.slane %v1306_v53, 3 }
 0x1e3   : > { %v1443_v56 = vsel %vm1333_vm1, %v1442_v34, %v1162_v31  ;;  %v1352_v11 = vsel %vm1339_vm4, %v1351_v47, %v1350_v16  ;;  %v1400_v52 = vsel %vm1384_vm5, %v1399_v57, %v1398_v45  ;;  %v1491_v5 = vrot.slane %v1310_v41, 2 }
 0x1e4   : > { %v1445_v26 = vsel %vm1336_vm2, %v1444_v59, %v1443_v56  ;;  %v1402_v33 = vsel %vm1387_vm6, %v1401_v23, %v1400_v52  ;;  %v1490_v19 = vsel %vm1381_vm3, %v1489_v51, %v1488_v50  ;;  %v1493_v21 = vrot.slane %v1314_v15, 1  ;;  %v5038_v56 = vld [vmem:[#allocation9_spill] sm:$0xff]  ;;  %v5040_v52 = vld [vmem:[#allocation31_spill] sm:$0xff] }
 0x1e5   : > { %v1447_v60 = vsel %vm1339_vm4, %v1446_v35, %v1445_v26  ;;  %v1492_v30 = vsel %vm1384_vm5, %v1491_v5, %v1490_v19  ;;  %v1509_v13 = vsel %vm1506_vm7, %v1352_v11, %v1402_v33  ;;  %v883_v37 = vsub.f32 %v3910_v14, %v4108_v62  ;;  %v5041_v33 = vld [vmem:[#allocation14_spill] sm:$0xff] }
 0x1e6   : > { %v887_v40 = vsub.f32 %v3956_v29, %v4108_v62  ;;  %v1494_v49 = vsel %vm1387_vm6, %v1493_v21, %v1492_v30  ;;  %v1519_v24 = vmul.f32 1.442695, %v1509_v13  ;;  %v891_v22 = vsub.f32 %v4004_v10, %v4108_v62 }
 0x1e7   : > { %v895_v27 = vsub.f32 %v4094_v54, %v4108_v62  ;;  %v1513_v18 = vsel %vm1506_vm7, %v1447_v60, %v1494_v49  ;;  %v1023_v63 = vsub.f32 %v3912_v28, %v4112_v7  ;;  %v1027_v14 = vsub.f32 %v3958_v9, %v4112_v7  ;;  %v5034_v62 = vld [vmem:[#allocation28_spill] sm:$0xff]  ;;  %v4212_v49 = vld [vmem:[%s4896_s3] sm:$0xff]  }
 0x1e8   : > { %v1031_v29 = vsub.f32 %v4006_v46, %v4112_v7  ;;  %3155 = vpow2.f32 %v1519_v24  ;;  %v1527_v12 = vmul.f32 1.442695, %v1513_v18  ;;  %v1035_v36 = vsub.f32 %v4096_v38, %v4112_v7  ;;  %v5037_v38 = vld [vmem:[#allocation29_spill] sm:$0xff]  ;;  %3125 = vmatprep.subr.msk.bf16.mxu0 %vm439_vm0, %v4212_v49 }
 0x1e9   : > { %v1163_v10 = vsub.f32 %v3914_v58, %v4116_v42  ;;  %v1167_v54 = vsub.f32 %v3960_v61, %v4116_v42  ;;  %v1171_v28 = vsub.f32 %v5034_v62, %v4116_v42  ;;  %v1175_v9 = vsub.f32 %v4098_v17, %v4116_v42 }
 0x1ea   : > { %v1303_v46 = vsub.f32 %v5035_v44, %v4120_v2  ;;  %3157 = vpow2.f32 %v1527_v12  ;;  %v1307_v43 = vsub.f32 %v5036_v8, %v4120_v2  ;;  %v1311_v7 = vsub.f32 %v5037_v38, %v4120_v2 }
 0x1eb   : > { %v1315_v58 = vsub.f32 %v4100_v39, %v4120_v2  ;;  %v1353_v61 = vrot.slane %v887_v40, 7  ;;  %v1355_v31 = vrot.slane %v891_v22, 6  ;;  %v1357_v1 = vrot.slane %v895_v27, 5  ;;  %v4184_v2 = vpop.permute.xlu0 %401  ;;  %v5042_v22 = vld [vmem:[#allocation15_spill] sm:$0xff] }
 0x1ec   : > { %v1403_v32 = vrot.slane %v1023_v63, 4  ;;  %v1404_v6 = vrot.slane %v1027_v14, 3  ;;  %v1406_v20 = vrot.slane %v1031_v29, 2  ;;  %v1408_v17 = vrot.slane %v1035_v36, 1  ;;  %v5043_v36 = vld [vmem:[#allocation21_spill] sm:$0xff] }
 0x1ed   : > { %v1448_v42 = vrot.slane %v1167_v54, 7  ;;  %v1354_v53 = vsel %vm1333_vm1, %v1353_v61, %v883_v37  ;;  %v1450_v41 = vrot.slane %v1171_v28, 6  ;;  %v1452_v15 = vrot.slane %v1175_v9, 5  ;;  %v5044_v9 = vld [vmem:[#allocation22_spill] sm:$0xff] }
 0x1ee   : > { %v1495_v4 = vrot.slane %v1303_v46, 4  ;;  %v1356_v0 = vsel %vm1336_vm2, %v1355_v31, %v1354_v53  ;;  %v1405_v47 = vsel %vm1381_vm3, %v1404_v6, %v1403_v32  ;;  %v1496_v39 = vrot.slane %v1307_v43, 3  ;;  %v5045_v31 = vld [vmem:[#allocation4_spill] sm:$0xff] }
 0x1ef   : > { %v1449_v3 = vsel %vm1333_vm1, %v1448_v42, %v1163_v10  ;;  %v1358_v48 = vsel %vm1339_vm4, %v1357_v1, %v1356_v0  ;;  %v1407_v57 = vsel %vm1384_vm5, %v1406_v20, %v1405_v47  ;;  %v1498_v34 = vrot.slane %v1311_v7, 2 }
 0x1f0   : > { %v1451_v23 = vsel %vm1336_vm2, %v1450_v41, %v1449_v3  ;;  %v1409_v25 = vsel %vm1387_vm6, %v1408_v17, %v1407_v57  ;;  %v1497_v35 = vsel %vm1381_vm3, %v1496_v39, %v1495_v4  ;;  %v1500_v50 = vrot.slane %v1315_v58, 1 }
 0x1f1   : > { %v1453_v59 = vsel %vm1339_vm4, %v1452_v15, %v1451_v23  ;;  %v1499_v16 = vsel %vm1384_vm5, %v1498_v34, %v1497_v35  ;;  %v1510_v45 = vsel %vm1506_vm7, %v1358_v48, %v1409_v25  ;;  %v5039_v51 = vrot.slane %v5038_v56, 4 }
 0x1f2   : > { %v1539_v26 = vrot.slane %v5040_v52, 4  ;;  %v4198_v5 = vpop.eup %3155  ;;  %v4202_v60 = vadd.f32 %v5041_v33, %v4184_v2  ;;  %v1501_v19 = vsel %vm1387_vm6, %v1500_v50, %v1499_v16  ;;  %v1521_v21 = vmul.f32 1.442695, %v1510_v45 }
 0x1f3   : > { %v1533_v11 = vadd.f32 %v5039_v51, %v5038_v56  ;;  %v1514_v30 = vsel %vm1506_vm7, %v1453_v59, %v1501_v19  ;;  %v1545_v40 = vsel %vm1506_vm7, %v4198_v5, 0.0  ;;  %v4218_v27 = vadd.f32 %v5042_v22, %v4184_v2 }
 0x1f4   : > { %v1540_v37 = vadd.f32 %v1539_v26, %v5040_v52  ;;  %v4214_v24 = vpop.eup %3157  ;;  %3159 = vpow2.f32 %v1521_v21  ;;  %v1529_v18 = vmul.f32 1.442695, %v1514_v30  ;;  %v1546_v63 = vrot.slane %v1545_v40, 4 }
 0x1f5   : > { %v1534_v13 = vrot.slane %v1533_v11, 2  ;;  %v1576_v12 = vlaneseq  ;;  %v1717_v10 = vrot.slane %v5043_v36, 4  ;;  %v3204_v62 = vmov 1966171168  }
 0x1f6   : > { %v1541_v29 = vrot.slane %v1540_v37, 2  ;;  %3161 = vpow2.f32 %v1529_v18  ;;  %v1547_v54 = vadd.f32 %v1546_v63, %v1545_v40  ;;  %v4223_v28 = vunpack.c.l.s4 %v3204_v62 }
 0x1f7   : > { %v1535_v14 = vadd.f32 %v1534_v13, %v1533_v11  ;;  %v1718_v44 = vrot.slane %v5044_v9, 4  ;;  %v1719_v43 = vrot.slane %v4198_v5, 4  ;;  %v1725_v38 = vsel %vm1506_vm7, %v1717_v10, 0.0 }
 0x1f8   : > { %v1542_v8 = vadd.f32 %v1541_v29, %v1540_v37  ;;  %v1548_v7 = vrot.slane %v1547_v54, 2  ;;  %v1726_v58 = vrot.slane %v1725_v38, 4  ;;  %v1907_v1 = vsel %vm1506_vm7, %v5045_v31, 0.0 }
 0x1f9   : > { %v1536_v46 = vrot.slane %v1535_v14, 1  ;;  %v1732_v61 = vsel %vm1506_vm7, %v1718_v44, 0.0  ;;  %v1739_v17 = vsel %vm1506_vm7, %v1719_v43, 0.0  ;;  %v1908_v15 = vrot.slane %v1907_v1, 4 }
 0x1fa   : > { %v1543_v6 = vrot.slane %v1542_v8, 1  ;;  %v1733_v20 = vrot.slane %v1732_v61, 4  ;;  %v1549_v42 = vadd.f32 %v1548_v7, %v1547_v54  ;;  %v1727_v53 = vadd.f32 %v1726_v58, %v1725_v38 }
 0x1fb   : > { %v1537_v32 = vadd.f32 %v1536_v46, %v1535_v14  ;;  %v1740_v41 = vrot.slane %v1739_v17, 4  ;;  %v1914_v47 = vsel %vm1506_vm7, %v4092_v55, 0.0  ;;  %v1909_v57 = vadd.f32 %v1908_v15, %v1907_v1 }
 0x1fc   : > { %v1544_v4 = vadd.f32 %v1543_v6, %v1542_v8  ;;  %v1734_v0 = vadd.f32 %v1733_v20, %v1732_v61  ;;  %v1550_v3 = vrot.slane %v1549_v42, 1  ;;  %v1728_v39 = vrot.slane %v1727_v53, 2 }
 0x1fd   : > { %3163 = vrcp.f32 %v1537_v32  ;;  %v1741_v48 = vadd.f32 %v1740_v41, %v1739_v17  ;;  %v1915_v34 = vrot.slane %v1914_v47, 4  ;;  %v1921_v25 = vsel %vm1506_vm7, %v4214_v24, 0.0 }
 0x1fe   : > { %3165 = vrcp.f32 %v1544_v4  ;;  %v1735_v23 = vrot.slane %v1734_v0, 2  ;;  %v4236_v59 = vpop.eup %3159  ;;  %v1551_v35 = vadd.f32 %v1550_v3, %v1549_v42  ;;  %v1729_v50 = vadd.f32 %v1728_v39, %v1727_v53 }
 0x1ff   : > { %v1742_v16 = vrot.slane %v1741_v48, 2  ;;  %v1910_v45 = vrot.slane %v1909_v57, 2  ;;  %v1552_v56 = vsel %vm1506_vm7, %v4236_v59, 0.0  ;;  %v1720_v51 = vrot.slane %v4236_v59, 4 }
 0x200   : > { %v1736_v11 = vadd.f32 %v1735_v23, %v1734_v0  ;;  %v1916_v52 = vadd.f32 %v1915_v34, %v1914_v47  ;;  %v4241_v26 = vpop.eup %3161  ;;  %v1553_v33 = vrot.slane %v1552_v56, 4  ;;  %3167 = vrcp.f32 %v1551_v35 }
 0x201   : > { %v1730_v19 = vrot.slane %v1729_v50, 1  ;;  %v1743_v21 = vadd.f32 %v1742_v16, %v1741_v48  ;;  %v1746_v13 = vsel %vm1506_vm7, %v1720_v51, 0.0  ;;  %v1911_v37 = vadd.f32 %v1910_v45, %v1909_v57 }
 0x202   : > { %v1737_v30 = vrot.slane %v1736_v11, 1  ;;  %v1917_v40 = vrot.slane %v1916_v52, 2  ;;  %v1554_v22 = vadd.f32 %v1553_v33, %v1552_v56  ;;  %v1747_v14 = vrot.slane %v1746_v13, 4 }
 0x203   : > { %v1731_v18 = vadd.f32 %v1730_v19, %v1729_v50  ;;  %v1744_v63 = vrot.slane %v1743_v21, 1  ;;  %v1912_v10 = vrot.slane %v1911_v37, 1  ;;  %v1922_v62 = vrot.slane %v1921_v25, 4 }
 0x204   : > { %v1738_v29 = vadd.f32 %v1737_v30, %v1736_v11  ;;  %v1918_v54 = vadd.f32 %v1917_v40, %v1916_v52  ;;  %v1555_v44 = vrot.slane %v1554_v22, 2  ;;  %v1748_v8 = vadd.f32 %v1747_v14, %v1746_v13 }
 0x205   : > { %v1745_v46 = vadd.f32 %v1744_v63, %v1743_v21  ;;  %3169 = vrcp.f32 %v1731_v18  ;;  %v1913_v38 = vadd.f32 %v1912_v10, %v1911_v37  ;;  %v1923_v58 = vadd.f32 %v1922_v62, %v1921_v25  ;;  %v5046_v62 = vld [vmem:[#allocation30_spill] sm:$0xff] }
 0x206   : > { %3171 = vrcp.f32 %v1738_v29  ;;  %v1919_v7 = vrot.slane %v1918_v54, 1  ;;  %v1556_v61 = vadd.f32 %v1555_v44, %v1554_v22  ;;  %v1749_v32 = vrot.slane %v1748_v8, 2  ;;  %v5047_v44 = vld [vmem:[#allocation17_spill] sm:$0xff] }
 0x207   : > { %v3164_v43 = vpop.eup %3163  ;;  %3173 = vrcp.f32 %v1745_v46  ;;  %v1924_v17 = vrot.slane %v1923_v58, 2  ;;  %v1928_v42 = vsel %vm1506_vm7, %v4241_v26, 0.0  ;;  %v2093_v47 = vrot.slane %v5045_v31, 4 }
 0x208   : > { %v4245_v1 = vmul.f32 %v3164_v43, %v5043_v36  ;;  %v3166_v6 = vpop.eup %3165  ;;  %v1920_v20 = vadd.f32 %v1919_v7, %v1918_v54  ;;  %3175 = vrcp.f32 %v1913_v38  ;;  %v1557_v53 = vrot.slane %v1556_v61, 1 }
 0x209   : > { %v4250_v41 = vmul.f32 %v3166_v6, %v5044_v9  ;;  %v1750_v15 = vadd.f32 %v1749_v32, %v1748_v8  ;;  %v1929_v4 = vrot.slane %v1928_v42, 4  ;;  %v1925_v0 = vadd.f32 %v1924_v17, %v1923_v58  ;;  %v5049_v32 = vld [vmem:[#allocation27_spill] sm:$0xff] }
 0x20a   : > { %3177 = vrcp.f32 %v1920_v20  ;;  %v2094_v3 = vrot.slane %v4092_v55, 4  ;;  %v3168_v39 = vpop.eup %3167  ;;  %v1558_v48 = vadd.f32 %v1557_v53, %v1556_v61  ;;  %v4257_v25 = vshrl.u32 %v1576_v12, 7 }
 0x20b   : > { %v1571_v57 = vcombine.low %v4245_v1, %v4250_v41  ;;  %v1751_v23 = vrot.slane %v1750_v15, 1  ;;  %v1930_v34 = vadd.f32 %v1929_v4, %v1928_v42  ;;  %v1926_v35 = vrot.slane %v1925_v0, 1 }
 0x20c   : > { %v2095_v50 = vrot.slane %v4214_v24, 4  ;;  %v2096_v16 = vrot.slane %v4241_v26, 4  ;;  %3179 = vrcp.f32 %v1558_v48  ;;  %v1575_v45 = vunpack.c.0.s8 %v4223_v28 }
 0x20d   : > { %v1752_v56 = vadd.f32 %v1751_v23, %v1750_v15  ;;  %v1931_v51 = vrot.slane %v1930_v34, 2  ;;  %v1927_v11 = vadd.f32 %v1926_v35, %v1925_v0  ;;  %v2101_v52 = vsel %vm1506_vm7, %v2093_v47, 0.0 }
 0x20e   : > { %v2108_v33 = vsel %vm1506_vm7, %v2094_v3, 0.0  ;;  %v2115_v19 = vsel %vm1506_vm7, %v2095_v50, 0.0  ;;  %v2102_v30 = vrot.slane %v2101_v52, 4  ;;  %v2122_v28 = vsel %vm1506_vm7, %v2096_v16, 0.0 }
 0x20f   : > { %v3170_v21 = vpop.eup %3169  ;;  %3181 = vrcp.f32 %v1752_v56  ;;  %v1932_v12 = vadd.f32 %v1931_v51, %v1930_v34  ;;  %v2109_v13 = vrot.slane %v2108_v33, 4  ;;  %v2116_v22 = vrot.slane %v2115_v19, 4 }
 0x210   : > { %v3172_v37 = vpop.eup %3171  ;;  %v1757_v40 = vmul.f32 %v3170_v21, %v5043_v36  ;;  %3183 = vrcp.f32 %v1927_v11  ;;  %v2103_v29 = vadd.f32 %v2102_v30, %v2101_v52  ;;  %v4270_v46 = vadd.f32 %v5047_v44, %v5046_v62 }
 0x211   : > { %v3174_v18 = vpop.eup %3173  ;;  %v1758_v63 = vmul.f32 %v3172_v37, %v5044_v9  ;;  %v1933_v14 = vrot.slane %v1932_v12, 1  ;;  %v2110_v10 = vadd.f32 %v2109_v13, %v2108_v33  ;;  %v4273_v8 = vsub.s32 %v1575_v45, %v4257_v25  ;;  %v5048_v9 = vld [vmem:[#allocation18_spill] sm:$0xff] }
 0x212   : > { %v3176_v54 = vpop.eup %3175  ;;  %v2117_v43 = vadd.f32 %v2116_v22, %v2115_v19  ;;  %v2123_v36 = vrot.slane %v2122_v28, 4  ;;  %v2104_v61 = vrot.slane %v2103_v29, 2  ;;  %v4278_v6 = vadd.f32 %v5049_v32, %v5048_v9  ;;  %v5052_v22 = vld [vmem:[#allocation24_spill] sm:$0xff] }
 0x213   : > { %v1765_v38 = vcombine.high %v1757_v40, %v1758_v63  ;;  %v1934_v7 = vadd.f32 %v1933_v14, %v1932_v12  ;;  %v1939_v58 = vmul.f32 %v3176_v54, %v5045_v31  ;;  %v2111_v20 = vrot.slane %v2110_v10, 2  ;;  %v5051_v40 = vld [vmem:[#allocation19_spill] sm:$0xff] }
 0x214   : > { %v3178_v1 = vpop.eup %3177  ;;  %v2118_v17 = vrot.slane %v2117_v43, 2  ;;  %v2124_v42 = vadd.f32 %v2123_v36, %v2122_v28  ;;  %v4281_v53 = vsub.s32 2, %v4257_v25  ;;  %v2105_v15 = vadd.f32 %v2104_v61, %v2103_v29  ;;  %v3146_v14 = vld [vmem:[%s4896_s3 + $0x8] sm:$0xff]  }
 0x215   : > { %3185 = vrcp.f32 %v1934_v7  ;;  %v1940_v41 = vmul.f32 %v3178_v1, %v4092_v55  ;;  %v1565_v4 = vmul.f32 %v3168_v39, %v4198_v5  ;;  %v2112_v0 = vadd.f32 %v2111_v20, %v2110_v10  ;;  %v5050_v39 = vld [vmem:[#allocation3_spill] sm:$0xff]  ;;  %v5056_v20 = vld [vmem:[#allocation6_spill] sm:$0xff] }
 0x216   : > { %v2119_v47 = vadd.f32 %v2118_v17, %v2117_v43  ;;  %v2125_v3 = vrot.slane %v2124_v42, 2  ;;  %v3180_v48 = vpop.eup %3179  ;;  %v1579_v23 = vrot.slane %v1571_v57, %v4273_v8  ;;  %v1759_v34 = vmul.f32 %v3174_v18, %v4198_v5  ;;  %v5053_v18 = vld [vmem:[#allocation25_spill] sm:$0xff] }
 0x217   : > { %v1947_v35 = vcombine.low %v1939_v58, %v1940_v41  ;;  %v2106_v50 = vrot.slane %v2105_v15, 1  ;;  %v1566_v16 = vmul.f32 %v3180_v48, %v4236_v59  ;;  %v2113_v45 = vrot.slane %v2112_v0, 1 }
 0x218   : > { %v2120_v56 = vrot.slane %v2119_v47, 1  ;;  %v2126_v51 = vadd.f32 %v2125_v3, %v2124_v42  ;;  %v1773_v52 = vrot.slane %v1765_v38, %v4273_v8  ;;  %v4291_v19 = vadd.f32 %v5050_v39, %v5048_v9  ;;  %v5055_v9 = vld [vmem:[#allocation26_spill] sm:$0xff]  ;;  %v5057_v42 = vld [vmem:[#allocation7_spill] sm:$0xff] }
 0x219   : > { %v3182_v11 = vpop.eup %3181  ;;  %v2107_v33 = vadd.f32 %v2106_v50, %v2105_v15  ;;  %v4294_v21 = vsub.s32 3, %v4257_v25  ;;  %v1572_v5 = vcombine.low %v1565_v4, %v1566_v16  ;;  %v2114_v30 = vadd.f32 %v2113_v45, %v2112_v0 }
 0x21a   : > { %v3184_v57 = vpop.eup %3183  ;;  %v1760_v12 = vmul.f32 %v3182_v11, %v4236_v59  ;;  %v2121_v13 = vadd.f32 %v2120_v56, %v2119_v47  ;;  %v2127_v37 = vrot.slane %v2126_v51, 1  ;;  %v4299_v28 = vadd.f32 %v5052_v22, %v5051_v40  ;;  %v5054_v59 = vld [vmem:[#allocation5_spill] sm:$0xff] }
 0x21b   : > { %3187 = vrcp.f32 %v2107_v33  ;;  %v4303_v63 = vadd.f32 %v5053_v18, %v5051_v40  ;;  %v1586_v29 = vrot.slane %v1572_v5, %v4273_v8  ;;  %v4311_v54 = vadd.f32 %v5054_v59, %v4184_v2 }
 0x21c   : > { %v1766_v10 = vcombine.high %v1759_v34, %v1760_v12  ;;  %3189 = vrcp.f32 %v2114_v30  ;;  %v1955_v44 = vrot.slane %v1947_v35, %v4273_v8  ;;  %v2128_v43 = vadd.f32 %v2127_v37, %v2126_v51 }
 0x21d   : > { %3191 = vrcp.f32 %v2121_v13  ;;  %v2473_v36 = vsel %vm439_vm0, %v4212_v49, 0  ;;  %v1587_v38 = vcombine.low %v1579_v23, %v1586_v29  ;;  %v1941_v58 = vmul.f32 %v3184_v57, %v4214_v24 }
 0x21e   : > { %v1780_v7 = vrot.slane %v1766_v10, %v4273_v8  ;;  %v1588_v61 = vcombine.high %v1579_v23, %v1586_v29  ;;  %3042 = vmatpush3.bf16.xpose.msra.mxu0 %v2473_v36  ;;  %3193 = vrcp.f32 %v2128_v43  ;;  %v4320_v32 = vadd.f32 %v5055_v9, %v4184_v2 }
 0x21f   : > { %v3186_v1 = vpop.eup %3185  ;;  %v4324_v17 = vadd.f32 %v5056_v20, %v5046_v62  ;;  %v4328_v49 = vadd.f32 %v5057_v42, %v5046_v62  ;;  %3126 = vmatprep.subr.msk.bf16.mxu0 %vm439_vm0, %v3146_v14  ;;  %v4332_v41 = vrot.slane %v1587_v38, %v4273_v8  ;;  %v4339_v47 = vsub.s32 1, %v4257_v25 }
 0x220   : > { %v1781_v15 = vcombine.low %v1773_v52, %v1780_v7  ;;  %v1942_v4 = vmul.f32 %v3186_v1, %v4241_v26  ;;  %v4336_v0 = vrot.slane %v1588_v61, %v4273_v8  ;;  %v1782_v2 = vcombine.high %v1773_v52, %v1780_v7 }
 0x221   : > { %v4342_v3 = vsub.s32 0, %v4257_v25  ;;  %v2476_v62 = vsel %vm439_vm0, %v3146_v14, 0  ;;  %v1616_v48 = vrot.slane %v4332_v41, %v4281_v53  ;;  %v1620_v35 = vrot.slane %v4332_v41, %v4294_v21 }
 0x222   : > { %v4348_v23 = vrot.slane %v1781_v15, %v4273_v8  ;;  %v1948_v34 = vcombine.low %v1941_v58, %v1942_v4  ;;  %v1632_v50 = vrot.slane %v4336_v0, %v4281_v53  ;;  %v4355_v16 = vrot.slane %v1782_v2, %v4273_v8 }
 0x223   : > { %v1636_v25 = vrot.slane %v4336_v0, %v4294_v21  ;;  %v4361_v45 = vcombine.high %v4332_v41, %v4332_v41  ;;  %v4364_v56 = vmul.f32 %v1616_v48, %v4278_v6  ;;  %v4370_v52 = vmul.f32 %v1620_v35, %v4291_v19 }
 0x224   : > { %v1810_v51 = vrot.slane %v4348_v23, %v4281_v53  ;;  %v1962_v11 = vrot.slane %v1948_v34, %v4273_v8  ;;  %v1814_v39 = vrot.slane %v4348_v23, %v4294_v21  ;;  %v4375_v57 = vmul.f32 %v1632_v50, %v4299_v28 }
 0x225   : > { %v3188_v33 = vpop.eup %3187  ;;  %v1826_v5 = vrot.slane %v4355_v16, %v4281_v53  ;;  %v4380_v12 = vmul.f32 %v1636_v25, %v4303_v63  ;;  %v1830_v59 = vrot.slane %v4355_v16, %v4294_v21  ;;  %v4409_v58 = vcombine.high %v4348_v23, %v4348_v23 }
 0x226   : > { %v3190_v30 = vpop.eup %3189  ;;  %v4383_v13 = vmul.f32 %v1810_v51, %v4278_v6  ;;  %v1963_v37 = vcombine.low %v1955_v44, %v1962_v11  ;;  %v2133_v40 = vmul.f32 %v3188_v33, %v5045_v31  ;;  %v1964_v22 = vcombine.high %v1955_v44, %v1962_v11  ;;  %3044 = vmatpush3.bf16.xpose.msra.mxu0 %v2476_v62 }
 0x227   : > { %v3192_v18 = vpop.eup %3191  ;;  %v2134_v14 = vmul.f32 %v3190_v30, %v4092_v55  ;;  %v4388_v29 = vmul.f32 %v1814_v39, %v4291_v19  ;;  %v4391_v10 = vmul.f32 %v1826_v5, %v4299_v28  ;;  %v1648_v55 = vrot.slane %v4361_v45, %v4281_v53 }
 0x228   : > { %v4396_v43 = vrot.slane %v1963_v37, %v4273_v8  ;;  %v2135_v36 = vmul.f32 %v3192_v18, %v4214_v24  ;;  %v4400_v31 = vrot.slane %v1964_v22, %v4273_v8  ;;  %v3194_v44 = vpop.eup %3193  ;;  %v4405_v7 = vmul.f32 %v1830_v59, %v4303_v63 }
 0x229   : > { %v2141_v38 = vcombine.high %v2133_v40, %v2134_v14  ;;  %v1652_v61 = vrot.slane %v4361_v45, %v4294_v21  ;;  %v2136_v1 = vmul.f32 %v3194_v44, %v4241_v26  ;;  %v4424_v4 = vmul.f32 %v1648_v55, %v4311_v54 }
 0x22a   : > { %v1992_v24 = vrot.slane %v4396_v43, %v4281_v53  ;;  %v1996_v9 = vrot.slane %v4396_v43, %v4294_v21  ;;  %v2008_v20 = vrot.slane %v4400_v31, %v4281_v53  ;;  %v2012_v15 = vrot.slane %v4400_v31, %v4294_v21 }
 0x22b   : > { %v2149_v42 = vrot.slane %v2141_v38, %v4273_v8  ;;  %v1842_v2 = vrot.slane %v4409_v58, %v4281_v53  ;;  %v2142_v26 = vcombine.high %v2135_v36, %v2136_v1  ;;  %v4437_v25 = vcombine.high %v4396_v43, %v4396_v43 }
 0x22c   : > { %v2063_v62 = vmul.f32 %v1992_v24, %v4278_v6  ;;  %v2064_v48 = vmul.f32 %v1996_v9, %v4291_v19  ;;  %v2067_v34 = vmul.f32 %v2008_v20, %v4299_v28  ;;  %v2068_v35 = vmul.f32 %v2012_v15, %v4303_v63 }
 0x22d   : > { %v4433_v50 = vmul.f32 %v1842_v2, %v4311_v54  ;;  %v4440_v51 = vmul.f32 %v1652_v61, %v4320_v32  ;;  %v2156_v11 = vrot.slane %v2142_v26, %v4273_v8  ;;  %v1846_v39 = vrot.slane %v4409_v58, %v4294_v21 }
 0x22e   : > { %v2083_v33 = vadd.f32 %v2067_v34, %v2063_v62  ;;  %v4447_v5 = vcombine.high %v4400_v31, %v4400_v31  ;;  %v2086_v30 = vadd.f32 %v2068_v35, %v2064_v48  ;;  %v2024_v37 = vrot.slane %v4437_v25, %v4281_v53 }
 0x22f   : > { %v2028_v40 = vrot.slane %v4437_v25, %v4294_v21  ;;  %v4455_v22 = vcombine.high %v4336_v0, %v4336_v0  ;;  %v2157_v18 = vcombine.low %v2149_v42, %v2156_v11  ;;  %v2158_v14 = vcombine.high %v2149_v42, %v2156_v11 }
 0x230   : > { %v4458_v59 = vmul.f32 %v1846_v39, %v4320_v32  ;;  %v2040_v36 = vrot.slane %v4447_v5, %v4281_v53  ;;  %v2071_v55 = vmul.f32 %v2024_v37, %v4311_v54  ;;  %v2044_v38 = vrot.slane %v4447_v5, %v4294_v21  ;;  %v5060_v39 = vld [vmem:[#allocation11_spill] sm:$0xff] }
 0x231   : > { %v2072_v44 = vmul.f32 %v2028_v40, %v4320_v32  ;;  %v1612_v61 = vrot.slane %v4332_v41, %v4339_v47  ;;  %v4469_v24 = vrot.slane %v2157_v18, %v4273_v8  ;;  %v4472_v1 = vrot.slane %v2158_v14, %v4273_v8 }
 0x232   : > { %v4475_v9 = vmul.f32 %v2040_v36, %v4324_v17  ;;  %v1628_v20 = vrot.slane %v4336_v0, %v4339_v47  ;;  %v4479_v42 = vadd.f32 %v2083_v33, %v2071_v55  ;;  %v4484_v2 = vmul.f32 %v2044_v38, %v4328_v49 }
 0x233   : > { %v4481_v15 = vadd.f32 %v2086_v30, %v2072_v44  ;;  %v1644_v62 = vrot.slane %v4361_v45, %v4339_v47  ;;  %v2186_v8 = vrot.slane %v4469_v24, %v4281_v53  ;;  %v2190_v26 = vrot.slane %v4469_v24, %v4294_v21 }
 0x234   : > { %5058 = vst [vmem:[#allocation20_spill] sm:$0xff] %v4475_v9  ;;  %5059 = vst [vmem:[#allocation12_spill] sm:$0xff] %v4479_v42  ;;  %v2202_v48 = vrot.slane %v4472_v1, %v4281_v53  ;;  %v2206_v34 = vrot.slane %v4472_v1, %v4294_v21  ;;  %v4498_v35 = vcombine.high %v4469_v24, %v4469_v24 }
 0x235   : > { %v4502_v11 = vcombine.high %v4472_v1, %v4472_v1  ;;  %v1660_v33 = vrot.slane %v4455_v22, %v4339_v47  ;;  %v1686_v30 = vmul.f32 %v1612_v61, %v5060_v39  ;;  %v2257_v37 = vmul.f32 %v2186_v8, %v4278_v6  ;;  %v5061_v8 = vld [vmem:[#allocation13_spill] sm:$0xff] }
 0x236   : > { %v2258_v40 = vmul.f32 %v2190_v26, %v4291_v19  ;;  %v2261_v18 = vmul.f32 %v2202_v48, %v4299_v28  ;;  %v2262_v14 = vmul.f32 %v2206_v34, %v4303_v63  ;;  %v2218_v36 = vrot.slane %v4498_v35, %v4281_v53 }
 0x237   : > { %v2222_v55 = vrot.slane %v4498_v35, %v4294_v21  ;;  %v2234_v44 = vrot.slane %v4502_v11, %v4281_v53  ;;  %v2238_v38 = vrot.slane %v4502_v11, %v4294_v21  ;;  %v1690_v19 = vmul.f32 %v1628_v20, %v5061_v8 }
 0x238   : > { %v2277_v61 = vadd.f32 %v2261_v18, %v2257_v37  ;;  %v2280_v6 = vadd.f32 %v2262_v14, %v2258_v40  ;;  %v1694_v28 = vmul.f32 %v1644_v62, %v4218_v27  ;;  %v2265_v63 = vmul.f32 %v2218_v36, %v4311_v54 }
 0x239   : > { %v2266_v26 = vmul.f32 %v2222_v55, %v4320_v32  ;;  %v4524_v48 = vmul.f32 %v2234_v44, %v4324_v17  ;;  %v4527_v34 = vmul.f32 %v2238_v38, %v4328_v49  ;;  %v1698_v42 = vmul.f32 %v1660_v33, %v4270_v46 }
 0x23a   : > { %v1704_v9 = vadd.f32 %v1690_v19, %v1686_v30  ;;  %v4532_v37 = vcombine.high %v4355_v16, %v4355_v16  ;;  %v1806_v20 = vrot.slane %v4348_v23, %v4339_v47  ;;  %v4536_v62 = vadd.f32 %v2277_v61, %v2265_v63  ;;  %v5063_v19 = vld [vmem:[#allocation10_spill] sm:$0xff] }
 0x23b   : > { %v4538_v54 = vadd.f32 %v2280_v6, %v2266_v26  ;;  %v1822_v32 = vrot.slane %v4355_v16, %v4339_v47  ;;  %v1838_v40 = vrot.slane %v4409_v58, %v4339_v47  ;;  %v1608_v14 = vrot.slane %v4332_v41, %v4342_v3  ;;  %v5064_v41 = vld [vmem:[#allocation2_spill] sm:$0xff] }
 0x23c   : > { %5062 = vst [vmem:[#allocation28_spill] sm:$0xff] %v4536_v62  ;;  %v1705_v18 = vadd.f32 %v1704_v9, %v1694_v28  ;;  %v1854_v33 = vrot.slane %v4532_v37, %v4339_v47  ;;  %v1880_v30 = vmul.f32 %v1806_v20, %v5060_v39  ;;  %v1624_v44 = vrot.slane %v4336_v0, %v4342_v3  ;;  %v5065_v0 = vld [vmem:[#allocation16_spill] sm:$0xff] }
 0x23d   : > { %v1884_v36 = vmul.f32 %v1822_v32, %v5061_v8  ;;  %v1888_v55 = vmul.f32 %v1838_v40, %v4218_v27  ;;  %v1640_v38 = vrot.slane %v4361_v45, %v4342_v3  ;;  %v1656_v6 = vrot.slane %v4455_v22, %v4342_v3 }
 0x23e   : > { %v1706_v61 = vadd.f32 %v1705_v18, %v1698_v42  ;;  %v1892_v9 = vmul.f32 %v1854_v33, %v4270_v46  ;;  %v1685_v28 = vmul.f32 %v1608_v14, %v5063_v19  ;;  %v1689_v26 = vmul.f32 %v1624_v44, %v5064_v41 }
 0x23f   : > { %v1898_v63 = vadd.f32 %v1884_v36, %v1880_v30  ;;  %v1693_v20 = vmul.f32 %v1640_v38, %v4202_v60  ;;  %v1802_v32 = vrot.slane %v4348_v23, %v4342_v3  ;;  %v1697_v40 = vmul.f32 %v1656_v6, %v5065_v0 }
 0x240   : > { %v1818_v45 = vrot.slane %v4355_v16, %v4342_v3  ;;  %v1834_v42 = vrot.slane %v4409_v58, %v4342_v3  ;;  %v1850_v18 = vrot.slane %v4532_v37, %v4342_v3  ;;  %v1701_v30 = vadd.f32 %v1689_v26, %v1685_v28 }
 0x241   : > { %v1899_v33 = vadd.f32 %v1898_v63, %v1888_v55  ;;  %v1879_v14 = vmul.f32 %v1802_v32, %v5063_v19  ;;  %v1988_v36 = vrot.slane %v4396_v43, %v4339_v47  ;;  %v2004_v16 = vrot.slane %v4400_v31, %v4339_v47 }
 0x242   : > { %v1883_v23 = vmul.f32 %v1818_v45, %v5064_v41  ;;  %v1887_v44 = vmul.f32 %v1834_v42, %v4202_v60  ;;  %v1891_v38 = vmul.f32 %v1850_v18, %v5065_v0  ;;  %v1702_v6 = vadd.f32 %v1701_v30, %v1693_v20 }
 0x243   : > { %v1900_v58 = vadd.f32 %v1899_v33, %v1892_v9  ;;  %v2020_v55 = vrot.slane %v4437_v25, %v4339_v47  ;;  %v2036_v28 = vrot.slane %v4447_v5, %v4339_v47  ;;  %v2062_v26 = vmul.f32 %v1988_v36, %v5060_v39 }
 0x244   : > { %v1895_v63 = vadd.f32 %v1883_v23, %v1879_v14  ;;  %v2066_v32 = vmul.f32 %v2004_v16, %v5061_v8  ;;  %v2182_v45 = vrot.slane %v4469_v24, %v4339_v47  ;;  %v1703_v18 = vadd.f32 %v1702_v6, %v1697_v40 }
 0x245   : > { %v2284_v42 = vpack.c.bf16 %v1900_v58, %v1706_v61  ;;  %v2070_v62 = vmul.f32 %v2020_v55, %v4218_v27  ;;  %v2074_v9 = vmul.f32 %v2036_v28, %v4270_v46  ;;  %v2198_v30 = vrot.slane %v4472_v1, %v4339_v47 }
 0x246   : > { %v1896_v20 = vadd.f32 %v1895_v63, %v1887_v44  ;;  %v2080_v33 = vadd.f32 %v2066_v32, %v2062_v26  ;;  %v2214_v14 = vrot.slane %v4498_v35, %v4339_v47  ;;  %v2230_v36 = vrot.slane %v4502_v11, %v4339_v47 }
 0x247   : > { %2318 = vxpose.xlu1.c.b16.start [1/2] (short) %v2284_v42, 128  ;;  %v2256_v23 = vmul.f32 %v2182_v45, %v5060_v39  ;;  %v1984_v61 = vrot.slane %v4396_v43, %v4342_v3  ;;  %v2000_v40 = vrot.slane %v4400_v31, %v4342_v3  ;;  %v2260_v58 = vmul.f32 %v2198_v30, %v5061_v8 }
 0x248   : > { %v1897_v44 = vadd.f32 %v1896_v20, %v1891_v38  ;;  %v2081_v16 = vadd.f32 %v2080_v33, %v2070_v62  ;;  %v2264_v6 = vmul.f32 %v2214_v14, %v4218_v27  ;;  %v2268_v55 = vmul.f32 %v2230_v36, %v4270_v46 }
 0x249   : > { %v2016_v28 = vrot.slane %v4437_v25, %v4342_v3  ;;  %v2032_v47 = vrot.slane %v4447_v5, %v4342_v3  ;;  %v2061_v39 = vmul.f32 %v1984_v61, %v5063_v19  ;;  %v2274_v26 = vadd.f32 %v2260_v58, %v2256_v23 }
 0x24a   : > { %v2283_v43 = vpack.c.bf16 %v1897_v44, %v1703_v18  ;;  %v2082_v63 = vadd.f32 %v2081_v16, %v2074_v9  ;;  %v2065_v31 = vmul.f32 %v2000_v40, %v5064_v41  ;;  %v2178_v27 = vrot.slane %v4469_v24, %v4342_v3  ;;  %v5066_v40 = vld [vmem:[#allocation20_spill] sm:$0xff] }
 0x24b   : > { %v2069_v62 = vmul.f32 %v2016_v28, %v4202_v60  ;;  %v2073_v8 = vmul.f32 %v2032_v47, %v5065_v0  ;;  %v2194_v46 = vrot.slane %v4472_v1, %v4342_v3  ;;  %v2275_v25 = vadd.f32 %v2274_v26, %v2264_v6  ;;  %v5067_v44 = vld [vmem:[#allocation12_spill] sm:$0xff] }
 0x24c   : > { %2302 = vxpose.xlu0.c.b16.start [1/2] (short) %v2283_v43, 128  ;;  %v2077_v5 = vadd.f32 %v2065_v31, %v2061_v39  ;;  %v2210_v38 = vrot.slane %v4498_v35, %v4342_v3  ;;  %v2226_v32 = vrot.slane %v4502_v11, %v4342_v3  ;;  %v2255_v45 = vmul.f32 %v2178_v27, %v5063_v19 }
 0x24d   : > { %v2259_v42 = vmul.f32 %v2194_v46, %v5064_v41  ;;  %v1668_v18 = vrot.slane %v4455_v22, %v4294_v21  ;;  %v1710_v24 = vadd.f32 %v4380_v12, %v4370_v52  ;;  %v2276_v1 = vadd.f32 %v2275_v25, %v2268_v55 }
 0x24e   : > { %v2078_v9 = vadd.f32 %v2077_v5, %v2069_v62  ;;  %v2263_v20 = vmul.f32 %v2210_v38, %v4202_v60  ;;  %v2267_v33 = vmul.f32 %v2226_v32, %v5065_v0  ;;  %v1862_v11 = vrot.slane %v4532_v37, %v4294_v21 }
 0x24f   : > { %v2271_v35 = vadd.f32 %v2259_v42, %v2255_v45  ;;  %v1700_v30 = vmul.f32 %v1668_v18, %v4328_v49  ;;  %v1711_v3 = vadd.f32 %v1710_v24, %v4440_v51  ;;  %v2288_v19 = vpack.c.bf16 %v2276_v1, %v2082_v63 }
 0x250   : > { %v2079_v41 = vadd.f32 %v2078_v9, %v2073_v8  ;;  %v1904_v14 = vadd.f32 %v4405_v7, %v4388_v29  ;;  %v1664_v52 = vrot.slane %v4455_v22, %v4281_v53  ;;  %v1894_v0 = vmul.f32 %v1862_v11, %v4328_v49  ;;  %v4689_v11 = vld [vmem:[%s4897_s4] ss:$0 sm:$0xff] }
 0x251   : > { %v2272_v12 = vadd.f32 %v2271_v35, %v2263_v20  ;;  %v1712_v60 = vadd.f32 %v1711_v3, %v1700_v30  ;;  %v1707_v36 = vadd.f32 %v4375_v57, %v4364_v56  ;;  %2319 = vxpose.xlu1.c.b16.end [2/2] (short) %v2288_v19, 128  ;;  %v1858_v23 = vrot.slane %v4532_v37, %v4281_v53 }
 0x252   : > { %v1905_v51 = vadd.f32 %v1904_v14, %v4458_v59  ;;  %v1699_v21 = vmul.f32 %v1664_v52, %v4324_v17  ;;  %v1901_v29 = vadd.f32 %v4391_v10, %v4383_v13  ;;  %v2088_v49 = vadd.f32 %v4481_v15, %v4484_v2  ;;  %v5068_v10 = vld [vmem:[#allocation28_spill] sm:$0xff] }
 0x253   : > { %v2273_v7 = vadd.f32 %v2272_v12, %v2267_v33  ;;  %v1708_v22 = vadd.f32 %v1707_v36, %v4424_v4  ;;  %v2282_v56 = vadd.f32 %v4538_v54, %v4527_v34  ;;  %v1893_v59 = vmul.f32 %v1858_v23, %v4324_v17 }
 0x254   : > { %v1906_v57 = vadd.f32 %v1905_v51, %v1894_v0  ;;  %v1902_v61 = vadd.f32 %v1901_v29, %v4433_v50  ;;  %v2085_v53 = vadd.f32 %v5067_v44, %v5066_v40  ;;  %v2279_v4 = vadd.f32 %v5068_v10, %v4524_v48 }
 0x255   : > { %v2287_v37 = vpack.c.bf16 %v2273_v7, %v2079_v41  ;;  %v1709_v16 = vadd.f32 %v1708_v22, %v1699_v21  ;;  %v2290_v13 = vpack.c.bf16 %v2282_v56, %v2088_v49 }
 0x256   : > { %v2286_v58 = vpack.c.bf16 %v1906_v57, %v1712_v60  ;;  %v1903_v6 = vadd.f32 %v1902_v61, %v1893_v59  ;;  %v2289_v15 = vpack.c.bf16 %v2279_v4, %v2085_v53 }
 0x257   : > { %2303 = vxpose.xlu0.c.b16.end [2/2] (short) %v2287_v37, 128 }
 0x258   : > { %v2285_v2 = vpack.c.bf16 %v1903_v6, %v1709_v16 }
 0x26a   : > { %2350 = vxpose.xlu1.c.b16.start [1/2] (short) %v2286_v58, 128 }
 0x26e   : > { %2351 = vxpose.xlu1.c.b16.end [2/2] (short) %v2290_v13, 128 }
 0x270   : > { %2334 = vxpose.xlu0.c.b16.start [1/2] (short) %v2285_v2, 128 }
 0x274   : > { %2335 = vxpose.xlu0.c.b16.end [2/2] (short) %v2289_v15, 128 }
 0x2b3   : > { %v2326_v48 = vpop.trf.xlu1 }
 0x2b7   : > { %v2327_v47 = vpop.trf.xlu1 }
 0x2b9   : > { %v2310_v17 = vpop.trf.xlu0 }
 0x2ba   : > { %3045 = vmatprep.mubr.msk.bf16.mxu0 %vm439_vm0, %v2310_v17 }
 0x2bb   : > { %v2328_v43 = vpop.trf.xlu1 }
 0x2bd   : > { %v2311_v50 = vpop.trf.xlu0 }
 0x2be   : > { %3046 = vmatmul.mubr.msk.bf16.vlgmr.msra.gmra.mrb[0].mxu0 %vm439_vm0, %v2311_v50 }
 0x2bf   : > { %v2329_v26 = vpop.trf.xlu1 }
 0x2c1   : > { %v2312_v34 = vpop.trf.xlu0 }
 0x2c2   : > { %3049 = vmatprep.mubr.msk.bf16.mxu0 %vm439_vm0, %v2312_v34 }
 0x2c3   : > { %v2330_v31 = vpop.trf.xlu1 }
 0x2c5   : > { %v2313_v54 = vpop.trf.xlu0 }
 0x2c6   : > { %3050 = vmatmul.mubr.msk.bf16.gmra.mrb[4].mxu0 %vm439_vm0, %v2313_v54 }
 0x2c7   : > { %v2331_v62 = vpop.trf.xlu1 }
 0x2c9   : > { %v2314_v55 = vpop.trf.xlu0 }
 0x2ca   : > { %3053 = vmatprep.mubr.msk.bf16.mxu0 %vm439_vm0, %v2314_v55 }
 0x2cb   : > { %v2332_v27 = vpop.trf.xlu1 }
 0x2cd   : > { %v2315_v28 = vpop.trf.xlu0 }
 0x2ce   : > { %3054 = vmatmul.mubr.msk.bf16.gmra.mrb[8].mxu0 %vm439_vm0, %v2315_v28 }
 0x2cf   : > { %v2333_v25 = vpop.trf.xlu1 }
 0x2d1   : > { %v2316_v39 = vpop.trf.xlu0 }
 0x2d2   : > { %3057 = vmatprep.mubr.msk.bf16.mxu0 %vm439_vm0, %v2316_v39 }
 0x2d3   : > { %v2358_v42 = vpop.trf.xlu1 }
 0x2d5   : > { %v2317_v63 = vpop.trf.xlu0 }
 0x2d6   : > { %3058 = vmatmul.mubr.msk.bf16.gmra.mrb[12].mxu0 %vm439_vm0, %v2317_v63 }
 0x2d7   : > { %3061 = vmatprep.mubr.msk.bf16.mxu0 %vm439_vm0, %v2326_v48  ;;  %v2359_v24 = vpop.trf.xlu1 }
 0x2d9   : > { %v2342_v8 = vpop.trf.xlu0 }
 0x2db   : > { %v2360_v9 = vpop.trf.xlu1 }
 0x2dd   : > { %v2343_v46 = vpop.trf.xlu0 }
 0x2de   : > { %3062 = vmatmul.mubr.msk.bf16.gmra.mrb[16].mxu0 %vm439_vm0, %v2327_v47 }
 0x2df   : > { %3065 = vmatprep.mubr.msk.bf16.mxu0 %vm439_vm0, %v2328_v43  ;;  %v2361_v20 = vpop.trf.xlu1 }
 0x2e1   : > { %v2344_v5 = vpop.trf.xlu0 }
 0x2e3   : > { %v2362_v33 = vpop.trf.xlu1 }
 0x2e5   : > { %v2345_v38 = vpop.trf.xlu0 }
 0x2e6   : > { %3066 = vmatmul.mubr.msk.bf16.gmra.mrb[20].mxu0 %vm439_vm0, %v2329_v26 }
 0x2e7   : > { %3069 = vmatprep.mubr.msk.bf16.mxu0 %vm439_vm0, %v2330_v31  ;;  %v2363_v35 = vpop.trf.xlu1 }
 0x2e9   : > { %v2346_v32 = vpop.trf.xlu0 }
 0x2eb   : > { %v2364_v30 = vpop.trf.xlu1 }
 0x2ed   : > { %v2347_v45 = vpop.trf.xlu0 }
 0x2ee   : > { %3070 = vmatmul.mubr.msk.bf16.gmra.mrb[24].mxu0 %vm439_vm0, %v2331_v62 }
 0x2ef   : > { %3073 = vmatprep.mubr.msk.bf16.mxu0 %vm439_vm0, %v2332_v27  ;;  %v2365_v3 = vpop.trf.xlu1 }
 0x2f1   : > { %v2348_v18 = vpop.trf.xlu0 }
 0x2f5   : > { %v2349_v1 = vpop.trf.xlu0 }
 0x2f6   : > { %3074 = vmatmul.mubr.msk.bf16.gmra.mrb[28].mxu0 %vm439_vm0, %v2333_v25 }
 0x2f7   : > { %3077 = vmatprep.mubr.msk.bf16.mxu0 %vm439_vm0, %v2342_v8 }
 0x2fe   : > { %3078 = vmatmul.mubr.msk.bf16.gmra.mrb[32].mxu0 %vm439_vm0, %v2343_v46 }
 0x2ff   : > { %3081 = vmatprep.mubr.msk.bf16.mxu0 %vm439_vm0, %v2344_v5 }
 0x306   : > { %3082 = vmatmul.mubr.msk.bf16.gmra.mrb[36].mxu0 %vm439_vm0, %v2345_v38 }
 0x307   : > { %3085 = vmatprep.mubr.msk.bf16.mxu0 %vm439_vm0, %v2346_v32 }
 0x30e   : > { %3086 = vmatmul.mubr.msk.bf16.gmra.mrb[40].mxu0 %vm439_vm0, %v2347_v45 }
 0x30f   : > { %3089 = vmatprep.mubr.msk.bf16.mxu0 %vm439_vm0, %v2348_v18 }
 0x316   : > { %3090 = vmatmul.mubr.msk.bf16.gmra.mrb[44].mxu0 %vm439_vm0, %v2349_v1 }
 0x317   : > { %3093 = vmatprep.mubr.msk.bf16.mxu0 %vm439_vm0, %v2358_v42 }
 0x31e   : > { %3094 = vmatmul.mubr.msk.bf16.gmra.mrb[48].mxu0 %vm439_vm0, %v2359_v24 }
 0x31f   : > { %3097 = vmatprep.mubr.msk.bf16.mxu0 %vm439_vm0, %v2360_v9 }
 0x326   : > { %3098 = vmatmul.mubr.msk.bf16.gmra.mrb[52].mxu0 %vm439_vm0, %v2361_v20 }
 0x327   : > { %3101 = vmatprep.mubr.msk.bf16.mxu0 %vm439_vm0, %v2362_v33 }
 0x32e   : > { %3102 = vmatmul.mubr.msk.bf16.gmra.mrb[56].mxu0 %vm439_vm0, %v2363_v35 }
 0x32f   : > { %3105 = vmatprep.mubr.msk.bf16.mxu0 %vm439_vm0, %v2364_v30 }
 0x336   : > { %3106 = vmatmul.mubr.msk.bf16.gmra.mrb[60].mxu0 %vm439_vm0, %v2365_v3 }
 0x391   : > { %v3047_v19 = vpop.f32.mrb[0].mxu0 }
 0x392   : > { %v2521_v41 = vadd.f32 %v3047_v19, %v4689_v11  ;;  %v2512_v14 = vpop.f32.mrb[1].mxu0 }
 0x393   : > { %v2513_v52 = vadd.f32 %v4689_v11, %v2512_v14  ;;  %v3048_v12 = vpop.f32.mrb[2].mxu0 }
 0x394   : > { %2769 = vst.msk [vmem:[%s4696_s25 + $0x10] sm:$0xff] %vm439_vm0, %v2521_v41  ;;  %v2524_v60 = vadd.f32 %v3048_v12, %v4689_v11  ;;  %v2515_v0 = vpop.f32.mrb[3].mxu0 }
 0x395   : > { %2767 = vst.msk [vmem:[%s4696_s25] sm:$0xff] %vm439_vm0, %v2513_v52  ;;  %v2516_v36 = vadd.f32 %v4689_v11, %v2515_v0 }
 0x396   : > { %2770 = vst.msk [vmem:[%s4696_s25 + $0x18] sm:$0xff] %vm439_vm0, %v2524_v60 }
 0x397   : > { %2768 = vst.msk [vmem:[%s4696_s25 + $0x8] sm:$0xff] %vm439_vm0, %v2516_v36 }
 0x399   : > { %v3051_v51 = vpop.f32.mrb[4].mxu0 }
 0x39a   : > { %v2537_v21 = vadd.f32 %v3051_v51, %v4689_v11  ;;  %v2528_v23 = vpop.f32.mrb[5].mxu0 }
 0x39b   : > { %v2529_v29 = vadd.f32 %v4689_v11, %v2528_v23  ;;  %v3052_v7 = vpop.f32.mrb[6].mxu0 }
 0x39c   : > { %2773 = vst.msk [vmem:[%s4696_s25 + $0x30] sm:$0xff] %vm439_vm0, %v2537_v21  ;;  %v2540_v22 = vadd.f32 %v3052_v7, %v4689_v11  ;;  %v2531_v49 = vpop.f32.mrb[7].mxu0 }
 0x39d   : > { %2771 = vst.msk [vmem:[%s4696_s25 + $0x20] sm:$0xff] %vm439_vm0, %v2529_v29  ;;  %v2532_v56 = vadd.f32 %v4689_v11, %v2531_v49 }
 0x39e   : > { %2774 = vst.msk [vmem:[%s4696_s25 + $0x38] sm:$0xff] %vm439_vm0, %v2540_v22 }
 0x39f   : > { %2772 = vst.msk [vmem:[%s4696_s25 + $0x28] sm:$0xff] %vm439_vm0, %v2532_v56 }
 0x3a1   : > { %v3055_v57 = vpop.f32.mrb[8].mxu0 }
 0x3a2   : > { %v2553_v59 = vadd.f32 %v3055_v57, %v4689_v11  ;;  %v2544_v61 = vpop.f32.mrb[9].mxu0 }
 0x3a3   : > { %v2545_v40 = vadd.f32 %v4689_v11, %v2544_v61  ;;  %v3056_v44 = vpop.f32.mrb[10].mxu0 }
 0x3a4   : > { %2777 = vst.msk [vmem:[%s4696_s25 + $0x50] sm:$0xff] %vm439_vm0, %v2553_v59  ;;  %v2556_v53 = vadd.f32 %v3056_v44, %v4689_v11  ;;  %v2547_v37 = vpop.f32.mrb[11].mxu0 }
 0x3a5   : > { %2775 = vst.msk [vmem:[%s4696_s25 + $0x40] sm:$0xff] %vm439_vm0, %v2545_v40  ;;  %v2548_v16 = vadd.f32 %v4689_v11, %v2547_v37 }
 0x3a6   : > { %2778 = vst.msk [vmem:[%s4696_s25 + $0x58] sm:$0xff] %vm439_vm0, %v2556_v53 }
 0x3a7   : > { %2776 = vst.msk [vmem:[%s4696_s25 + $0x48] sm:$0xff] %vm439_vm0, %v2548_v16 }
 0x3a9   : > { %v3059_v13 = vpop.f32.mrb[12].mxu0 }
 0x3aa   : > { %v2569_v10 = vadd.f32 %v3059_v13, %v4689_v11  ;;  %v2560_v4 = vpop.f32.mrb[13].mxu0 }
 0x3ab   : > { %v2561_v58 = vadd.f32 %v4689_v11, %v2560_v4  ;;  %v3060_v6 = vpop.f32.mrb[14].mxu0 }
 0x3ac   : > { %2781 = vst.msk [vmem:[%s4696_s25 + $0x70] sm:$0xff] %vm439_vm0, %v2569_v10  ;;  %v2572_v15 = vadd.f32 %v3060_v6, %v4689_v11  ;;  %v2563_v2 = vpop.f32.mrb[15].mxu0 }
 0x3ad   : > { %2779 = vst.msk [vmem:[%s4696_s25 + $0x60] sm:$0xff] %vm439_vm0, %v2561_v58  ;;  %v2564_v17 = vadd.f32 %v4689_v11, %v2563_v2 }
 0x3ae   : > { %2782 = vst.msk [vmem:[%s4696_s25 + $0x78] sm:$0xff] %vm439_vm0, %v2572_v15 }
 0x3af   : > { %2780 = vst.msk [vmem:[%s4696_s25 + $0x68] sm:$0xff] %vm439_vm0, %v2564_v17 }
 0x3b1   : > { %v3063_v50 = vpop.f32.mrb[16].mxu0 }
 0x3b2   : > { %v2585_v34 = vadd.f32 %v3063_v50, %v4689_v11  ;;  %v2576_v54 = vpop.f32.mrb[17].mxu0 }
 0x3b3   : > { %v2577_v48 = vadd.f32 %v4689_v11, %v2576_v54  ;;  %v3064_v55 = vpop.f32.mrb[18].mxu0 }
 0x3b4   : > { %2785 = vst.msk [vmem:[%s4696_s25 + $0x90] sm:$0xff] %vm439_vm0, %v2585_v34  ;;  %v2588_v28 = vadd.f32 %v3064_v55, %v4689_v11  ;;  %v2579_v47 = vpop.f32.mrb[19].mxu0 }
 0x3b5   : > { %2783 = vst.msk [vmem:[%s4696_s25 + $0x80] sm:$0xff] %vm439_vm0, %v2577_v48  ;;  %v2580_v39 = vadd.f32 %v4689_v11, %v2579_v47 }
 0x3b6   : > { %2786 = vst.msk [vmem:[%s4696_s25 + $0x98] sm:$0xff] %vm439_vm0, %v2588_v28 }
 0x3b7   : > { %2784 = vst.msk [vmem:[%s4696_s25 + $0x88] sm:$0xff] %vm439_vm0, %v2580_v39 }
 0x3b9   : > { %v3067_v43 = vpop.f32.mrb[20].mxu0 }
 0x3ba   : > { %v2601_v63 = vadd.f32 %v3067_v43, %v4689_v11  ;;  %v2592_v26 = vpop.f32.mrb[21].mxu0 }
 0x3bb   : > { %v2593_v31 = vadd.f32 %v4689_v11, %v2592_v26  ;;  %v3068_v62 = vpop.f32.mrb[22].mxu0 }
 0x3bc   : > { %2789 = vst.msk [vmem:[%s4696_s25 + $0xb0] sm:$0xff] %vm439_vm0, %v2601_v63  ;;  %v2604_v8 = vadd.f32 %v3068_v62, %v4689_v11  ;;  %v2595_v27 = vpop.f32.mrb[23].mxu0 }
 0x3bd   : > { %2787 = vst.msk [vmem:[%s4696_s25 + $0xa0] sm:$0xff] %vm439_vm0, %v2593_v31  ;;  %v2596_v46 = vadd.f32 %v4689_v11, %v2595_v27 }
 0x3be   : > { %2790 = vst.msk [vmem:[%s4696_s25 + $0xb8] sm:$0xff] %vm439_vm0, %v2604_v8 }
 0x3bf   : > { %2788 = vst.msk [vmem:[%s4696_s25 + $0xa8] sm:$0xff] %vm439_vm0, %v2596_v46 }
 0x3c1   : > { %v3071_v25 = vpop.f32.mrb[24].mxu0 }
 0x3c2   : > { %v2617_v5 = vadd.f32 %v3071_v25, %v4689_v11  ;;  %v2608_v38 = vpop.f32.mrb[25].mxu0 }
 0x3c3   : > { %v2609_v32 = vadd.f32 %v4689_v11, %v2608_v38  ;;  %v3072_v45 = vpop.f32.mrb[26].mxu0 }
 0x3c4   : > { %2793 = vst.msk [vmem:[%s4696_s25 + $0xd0] sm:$0xff] %vm439_vm0, %v2617_v5  ;;  %v2620_v42 = vadd.f32 %v3072_v45, %v4689_v11  ;;  %v2611_v18 = vpop.f32.mrb[27].mxu0 }
 0x3c5   : > { %2791 = vst.msk [vmem:[%s4696_s25 + $0xc0] sm:$0xff] %vm439_vm0, %v2609_v32  ;;  %v2612_v24 = vadd.f32 %v4689_v11, %v2611_v18 }
 0x3c6   : > { %2794 = vst.msk [vmem:[%s4696_s25 + $0xd8] sm:$0xff] %vm439_vm0, %v2620_v42 }
 0x3c7   : > { %2792 = vst.msk [vmem:[%s4696_s25 + $0xc8] sm:$0xff] %vm439_vm0, %v2612_v24 }
 0x3c9   : > { %v3075_v1 = vpop.f32.mrb[28].mxu0 }
 0x3ca   : > { %v2633_v9 = vadd.f32 %v3075_v1, %v4689_v11  ;;  %v2624_v20 = vpop.f32.mrb[29].mxu0 }
 0x3cb   : > { %v2625_v33 = vadd.f32 %v4689_v11, %v2624_v20  ;;  %v3076_v35 = vpop.f32.mrb[30].mxu0 }
 0x3cc   : > { %2797 = vst.msk [vmem:[%s4696_s25 + $0xf0] sm:$0xff] %vm439_vm0, %v2633_v9  ;;  %v2636_v30 = vadd.f32 %v3076_v35, %v4689_v11  ;;  %v2627_v3 = vpop.f32.mrb[31].mxu0 }
 0x3cd   : > { %2795 = vst.msk [vmem:[%s4696_s25 + $0xe0] sm:$0xff] %vm439_vm0, %v2625_v33  ;;  %v2628_v19 = vadd.f32 %v4689_v11, %v2627_v3 }
 0x3ce   : > { %2798 = vst.msk [vmem:[%s4696_s25 + $0xf8] sm:$0xff] %vm439_vm0, %v2636_v30 }
 0x3cf   : > { %2796 = vst.msk [vmem:[%s4696_s25 + $0xe8] sm:$0xff] %vm439_vm0, %v2628_v19 }
 0x3d1   : > { %v3079_v41 = vpop.f32.mrb[32].mxu0 }
 0x3d2   : > { %v2649_v14 = vadd.f32 %v3079_v41, %v4689_v11  ;;  %v2640_v52 = vpop.f32.mrb[33].mxu0 }
 0x3d3   : > { %v2641_v12 = vadd.f32 %v4689_v11, %v2640_v52  ;;  %v3080_v60 = vpop.f32.mrb[34].mxu0 }
 0x3d4   : > { %2801 = vst.msk [vmem:[%s4696_s25 + $0x110] sm:$0xff] %vm439_vm0, %v2649_v14  ;;  %v2652_v0 = vadd.f32 %v3080_v60, %v4689_v11  ;;  %v2643_v36 = vpop.f32.mrb[35].mxu0 }
 0x3d5   : > { %2799 = vst.msk [vmem:[%s4696_s25 + $0x100] sm:$0xff] %vm439_vm0, %v2641_v12  ;;  %v2644_v51 = vadd.f32 %v4689_v11, %v2643_v36 }
 0x3d6   : > { %2802 = vst.msk [vmem:[%s4696_s25 + $0x118] sm:$0xff] %vm439_vm0, %v2652_v0 }
 0x3d7   : > { %2800 = vst.msk [vmem:[%s4696_s25 + $0x108] sm:$0xff] %vm439_vm0, %v2644_v51 }
 0x3d9   : > { %v3083_v21 = vpop.f32.mrb[36].mxu0 }
 0x3da   : > { %v2665_v23 = vadd.f32 %v3083_v21, %v4689_v11  ;;  %v2656_v29 = vpop.f32.mrb[37].mxu0 }
 0x3db   : > { %v2657_v7 = vadd.f32 %v4689_v11, %v2656_v29  ;;  %v3084_v22 = vpop.f32.mrb[38].mxu0 }
 0x3dc   : > { %2805 = vst.msk [vmem:[%s4696_s25 + $0x130] sm:$0xff] %vm439_vm0, %v2665_v23  ;;  %v2668_v49 = vadd.f32 %v3084_v22, %v4689_v11  ;;  %v2659_v56 = vpop.f32.mrb[39].mxu0 }
 0x3dd   : > { %2803 = vst.msk [vmem:[%s4696_s25 + $0x120] sm:$0xff] %vm439_vm0, %v2657_v7  ;;  %v2660_v57 = vadd.f32 %v4689_v11, %v2659_v56 }
 0x3de   : > { %2806 = vst.msk [vmem:[%s4696_s25 + $0x138] sm:$0xff] %vm439_vm0, %v2668_v49 }
 0x3df   : > { %2804 = vst.msk [vmem:[%s4696_s25 + $0x128] sm:$0xff] %vm439_vm0, %v2660_v57 }
 0x3e1   : > { %v3087_v59 = vpop.f32.mrb[40].mxu0 }
 0x3e2   : > { %v2681_v61 = vadd.f32 %v3087_v59, %v4689_v11  ;;  %v2672_v40 = vpop.f32.mrb[41].mxu0 }
 0x3e3   : > { %v2673_v44 = vadd.f32 %v4689_v11, %v2672_v40  ;;  %v3088_v53 = vpop.f32.mrb[42].mxu0 }
 0x3e4   : > { %2809 = vst.msk [vmem:[%s4696_s25 + $0x150] sm:$0xff] %vm439_vm0, %v2681_v61  ;;  %v2684_v37 = vadd.f32 %v3088_v53, %v4689_v11  ;;  %v2675_v16 = vpop.f32.mrb[43].mxu0 }
 0x3e5   : > { %2807 = vst.msk [vmem:[%s4696_s25 + $0x140] sm:$0xff] %vm439_vm0, %v2673_v44  ;;  %v2676_v13 = vadd.f32 %v4689_v11, %v2675_v16 }
 0x3e6   : > { %2810 = vst.msk [vmem:[%s4696_s25 + $0x158] sm:$0xff] %vm439_vm0, %v2684_v37 }
 0x3e7   : > { %2808 = vst.msk [vmem:[%s4696_s25 + $0x148] sm:$0xff] %vm439_vm0, %v2676_v13 }
 0x3e9   : > { %v3091_v10 = vpop.f32.mrb[44].mxu0 }
 0x3ea   : > { %v2697_v4 = vadd.f32 %v3091_v10, %v4689_v11  ;;  %v2688_v58 = vpop.f32.mrb[45].mxu0 }
 0x3eb   : > { %v2689_v6 = vadd.f32 %v4689_v11, %v2688_v58  ;;  %v3092_v15 = vpop.f32.mrb[46].mxu0 }
 0x3ec   : > { %2813 = vst.msk [vmem:[%s4696_s25 + $0x170] sm:$0xff] %vm439_vm0, %v2697_v4  ;;  %v2700_v2 = vadd.f32 %v3092_v15, %v4689_v11  ;;  %v2691_v17 = vpop.f32.mrb[47].mxu0 }
 0x3ed   : > { %2811 = vst.msk [vmem:[%s4696_s25 + $0x160] sm:$0xff] %vm439_vm0, %v2689_v6  ;;  %v2692_v50 = vadd.f32 %v4689_v11, %v2691_v17 }
 0x3ee   : > { %2814 = vst.msk [vmem:[%s4696_s25 + $0x178] sm:$0xff] %vm439_vm0, %v2700_v2 }
 0x3ef   : > { %2812 = vst.msk [vmem:[%s4696_s25 + $0x168] sm:$0xff] %vm439_vm0, %v2692_v50 }
 0x3f1   : > { %v3095_v34 = vpop.f32.mrb[48].mxu0 }
 0x3f2   : > { %v2713_v54 = vadd.f32 %v3095_v34, %v4689_v11  ;;  %v2704_v48 = vpop.f32.mrb[49].mxu0 }
 0x3f3   : > { %v2705_v55 = vadd.f32 %v4689_v11, %v2704_v48  ;;  %v3096_v28 = vpop.f32.mrb[50].mxu0 }
 0x3f4   : > { %2817 = vst.msk [vmem:[%s4696_s25 + $0x190] sm:$0xff] %vm439_vm0, %v2713_v54  ;;  %v2716_v47 = vadd.f32 %v3096_v28, %v4689_v11  ;;  %v2707_v39 = vpop.f32.mrb[51].mxu0 }
 0x3f5   : > { %2815 = vst.msk [vmem:[%s4696_s25 + $0x180] sm:$0xff] %vm439_vm0, %v2705_v55  ;;  %v2708_v43 = vadd.f32 %v4689_v11, %v2707_v39 }
 0x3f6   : > { %2818 = vst.msk [vmem:[%s4696_s25 + $0x198] sm:$0xff] %vm439_vm0, %v2716_v47 }
 0x3f7   : > { %2816 = vst.msk [vmem:[%s4696_s25 + $0x188] sm:$0xff] %vm439_vm0, %v2708_v43 }
 0x3f9   : > { %v3099_v63 = vpop.f32.mrb[52].mxu0 }
 0x3fa   : > { %v2729_v26 = vadd.f32 %v3099_v63, %v4689_v11  ;;  %v2720_v31 = vpop.f32.mrb[53].mxu0 }
 0x3fb   : > { %v2721_v62 = vadd.f32 %v4689_v11, %v2720_v31  ;;  %v3100_v8 = vpop.f32.mrb[54].mxu0 }
 0x3fc   : > { %2821 = vst.msk [vmem:[%s4696_s25 + $0x1b0] sm:$0xff] %vm439_vm0, %v2729_v26  ;;  %v2732_v27 = vadd.f32 %v3100_v8, %v4689_v11  ;;  %v2723_v46 = vpop.f32.mrb[55].mxu0 }
 0x3fd   : > { %2819 = vst.msk [vmem:[%s4696_s25 + $0x1a0] sm:$0xff] %vm439_vm0, %v2721_v62  ;;  %v2724_v25 = vadd.f32 %v4689_v11, %v2723_v46 }
 0x3fe   : > { %2822 = vst.msk [vmem:[%s4696_s25 + $0x1b8] sm:$0xff] %vm439_vm0, %v2732_v27 }
 0x3ff   : > { %2820 = vst.msk [vmem:[%s4696_s25 + $0x1a8] sm:$0xff] %vm439_vm0, %v2724_v25 }
 0x401   : > { %v3103_v5 = vpop.f32.mrb[56].mxu0 }
 0x402   : > { %v2745_v38 = vadd.f32 %v3103_v5, %v4689_v11  ;;  %v2736_v32 = vpop.f32.mrb[57].mxu0 }
 0x403   : > { %v2737_v45 = vadd.f32 %v4689_v11, %v2736_v32  ;;  %v3104_v42 = vpop.f32.mrb[58].mxu0 }
 0x404   : > { %2825 = vst.msk [vmem:[%s4696_s25 + $0x1d0] sm:$0xff] %vm439_vm0, %v2745_v38  ;;  %v2748_v18 = vadd.f32 %v3104_v42, %v4689_v11  ;;  %v2739_v24 = vpop.f32.mrb[59].mxu0 }
 0x405   : > { %2823 = vst.msk [vmem:[%s4696_s25 + $0x1c0] sm:$0xff] %vm439_vm0, %v2737_v45  ;;  %v2740_v1 = vadd.f32 %v4689_v11, %v2739_v24 }
 0x406   : > { %2826 = vst.msk [vmem:[%s4696_s25 + $0x1d8] sm:$0xff] %vm439_vm0, %v2748_v18 }
 0x407   : > { %2824 = vst.msk [vmem:[%s4696_s25 + $0x1c8] sm:$0xff] %vm439_vm0, %v2740_v1 }
 0x409   : > { %v3107_v9 = vpop.f32.mrb[60].mxu0 }
 0x40a   : > { %v2761_v20 = vadd.f32 %v3107_v9, %v4689_v11  ;;  %v2752_v33 = vpop.f32.mrb[61].mxu0 }
 0x40b   : > { %v2753_v35 = vadd.f32 %v4689_v11, %v2752_v33  ;;  %v3108_v30 = vpop.f32.mrb[62].mxu0 }
 0x40c   : > { %2829 = vst.msk [vmem:[%s4696_s25 + $0x1f0] sm:$0xff] %vm439_vm0, %v2761_v20  ;;  %v2764_v3 = vadd.f32 %v3108_v30, %v4689_v11  ;;  %v2755_v19 = vpop.f32.mrb[63].mxu0 }
 0x40d   : > { %2827 = vst.msk [vmem:[%s4696_s25 + $0x1e0] sm:$0xff] %vm439_vm0, %v2753_v35  ;;  %v2756_v41 = vadd.f32 %v4689_v11, %v2755_v19 }
 0x40e   : > { %2830 = vst.msk [vmem:[%s4696_s25 + $0x1f8] sm:$0xff] %vm439_vm0, %v2764_v3 }
 0x40f   : > { %2828 = vst.msk [vmem:[%s4696_s25 + $0x1e8] sm:$0xff] %vm439_vm0, %v2756_v41 }
 0x410 PF: > { %s15_s18 = sadd.s32 1, %s3201_s18  }
 0x411   : > { %p12_p4 = scmp.ge.s32.totalorder %s15_s18, 4  }
 0x413   :  { %14 = sbr.rel (!%p12_p4) target bundleno = 1 (0x1), region = 70 }

</bundles_post_ra>
